<compile_context>
chip_gen: v6e
topology: v6e:2x2x1
jax: 0.10.0
libtpu: 0.0.40
codegen_flags: <defaults>
</compile_context>

<pallas_src>
import functools

import jax
import jax.numpy as jnp
from jax import lax
from jax.experimental import pallas as pl
from jax.experimental.pallas import tpu as pltpu

KH, KW = 3, 3
PAD = (KH // 2, KW // 2)       # padding = kernel // 2 (used by the lax reference)
NEG_SLOPE = 0.01               # nn.LeakyReLU() default
MXU_DTYPE = jnp.bfloat16       # MXU input dtype (f32 accumulation on the MXU)


def _pconv_kernel(x_ref, m_ref, sx_ref, sm_ref, w_ref, out_ref, nmask_ref,
                  pad_ref, col_ref, *, H, W, Cin, Cskip, Cout):
    """Partial conv + LeakyReLU for one image, spatial-flattened (lane-dense) layout.

    x_ref  : (1, Cin,   P)   upsampled decoder input   (P = H*W on the lane axis)
    m_ref  : (1, Cin,   P)   upsampled decoder mask
    sx_ref : (1, Cskip, P)   skip input
    sm_ref : (1, Cskip, P)   skip mask
    w_ref  : (Cout+1, KH*KW*2*Ctot)   extended weight: rows 0..Cout-1 act on the
             masked-input taps; the last (all-ones) row sums the mask taps, so the
             conv and the mask-sum ride a single MXU matmul.
    out_ref  : (1, Cout, P)  normalized conv output, holes = 0, LeakyReLU applied
    nmask_ref: (1, Cout, P)  updated binary mask
    pad_ref  : (2*Ctot, P + 2*W + 2) f32 scratch -- [x*m ; m] with a flat halo
    col_ref  : (KH*KW*2*Ctot, P) bf16 scratch    -- im2col buffer for the matmul
    """
    P = H * W
    Ctot = Cin + Cskip
    C2 = 2 * Ctot
    off = W + 1                          # W+1 halo zeros in front / back of the flat image

    # ---- padded, masked, channel-concatenated flat buffer in VMEM --------------
    # (replaces jnp.pad + channel concat in the XLA wrapper -> no HBM round trips)
    pad_ref[...] = jnp.zeros_like(pad_ref)
    pad_ref[0:Cin, off:off + P] = x_ref[0] * m_ref[0]
    pad_ref[Cin:Ctot, off:off + P] = sx_ref[0] * sm_ref[0]
    pad_ref[Ctot:Ctot + Cin, off:off + P] = m_ref[0]
    pad_ref[Ctot + Cin:C2, off:off + P] = sm_ref[0]

    # ---- column-edge masks: undo the row wrap-around of the flattened layout ---
    col_pos = lax.broadcasted_iota(jnp.int32, (1, P), 1) % W
    not_left = (col_pos != 0).astype(jnp.float32)
    not_right = (col_pos != W - 1).astype(jnp.float32)

    # ---- im2col: one (2*Ctot, P) slab per tap, stored at aligned row offsets ----
    for ky in range(KH):
        for kx in range(KW):
            t = ky * KW + kx
            s = ky * W + kx              # static lane offset into the halo'd buffer
            slab = pad_ref[:, s:s + P]   # (2*Ctot, P), f32
            if kx == 0:
                slab = slab * not_left
            elif kx == KW - 1:
                slab = slab * not_right
            col_ref[t * C2:(t + 1) * C2, :] = slab.astype(col_ref.dtype)

    # ---- single MXU matmul: (Cout+1, 9*2*Ctot) @ (9*2*Ctot, P), f32 accumulate --
    res = jnp.dot(w_ref[...], col_ref[...], preferred_element_type=jnp.float32)
    acc = res[0:Cout, :]                 # masked-input convolution
    msum = res[Cout:Cout + 1, :]         # fused mask-sum (all-ones weight row)

    # TODO(synk): NVIDIA-style PartialConv2d additionally scales by slide_winsize /
    # mask_sum; this keeps the plain 1/mask_sum normalization of the previous version.
    holes = msum == 0.0
    denom = jnp.where(holes, 1.0, msum)
    r = pl.reciprocal(denom, approx=True)     # EUP slot
    r = r * (2.0 - denom * r)                 # one Newton step -> ~f32 accuracy
    out = acc * r
    out = jnp.where(holes, 0.0, out)
    out = jnp.where(out >= 0.0, out, NEG_SLOPE * out)   # LeakyReLU (bn disabled)

    out_ref[0] = out
    nmask_ref[0] = jnp.broadcast_to(jnp.where(holes, 0.0, 1.0), (Cout, P))


def _build_extended_weight(weight, Cin, Cskip, dtype=MXU_DTYPE):
    """(Cout, Cin+Cskip, KH, KW) -> (Cout+1, KH*KW*2*(Cin+Cskip)), tap-major.

    Per tap t = ky*KW+kx the K-dim block layout is [x*m channels | mask channels];
    rows 0..Cout-1 hold the conv weight on the x*m half (zeros on the mask half),
    the final row is all-ones on the mask half (fuses mask-sum into the matmul).
    """
    Cout, Ctot, kh, kw = weight.shape
    assert Ctot == Cin + Cskip and (kh, kw) == (KH, KW)
    w_t = jnp.transpose(weight, (0, 2, 3, 1)).astype(jnp.float32)        # (Cout,KH,KW,Ctot)
    conv_rows = jnp.concatenate([w_t, jnp.zeros_like(w_t)], axis=-1)      # (Cout,KH,KW,2Ctot)
    ones_row = jnp.concatenate(
        [jnp.zeros((1, KH, KW, Ctot), jnp.float32),
         jnp.ones((1, KH, KW, Ctot), jnp.float32)], axis=-1)              # (1,KH,KW,2Ctot)
    w_ext = jnp.concatenate([conv_rows, ones_row], axis=0)                # (Cout+1,KH,KW,2Ctot)
    return w_ext.reshape(Cout + 1, KH * KW * 2 * Ctot).astype(dtype)


def _partial_conv_pallas(h, hm, sx, sm, w_ext, H, W):
    """h/hm: (N, Cin, H*W); sx/sm: (N, Cskip, H*W); w_ext: (Cout+1, KH*KW*2*Ctot)."""
    N, Cin, P = h.shape
    Cskip = sx.shape[1]
    Cout = w_ext.shape[0] - 1
    C2 = 2 * (Cin + Cskip)
    K2 = KH * KW * C2
    Pp = P + 2 * W + 2

    kernel = functools.partial(_pconv_kernel, H=H, W=W, Cin=Cin, Cskip=Cskip, Cout=Cout)

    out, nmask = pl.pallas_call(
        kernel,
        out_shape=(
            jax.ShapeDtypeStruct((N, Cout, P), jnp.float32),
            jax.ShapeDtypeStruct((N, Cout, P), jnp.float32),
        ),
        grid_spec=pltpu.PrefetchScalarGridSpec(
            num_scalar_prefetch=0,
            grid=(N,),
            in_specs=[
                pl.BlockSpec((1, Cin, P), lambda n: (n, 0, 0)),
                pl.BlockSpec((1, Cin, P), lambda n: (n, 0, 0)),
                pl.BlockSpec((1, Cskip, P), lambda n: (n, 0, 0)),
                pl.BlockSpec((1, Cskip, P), lambda n: (n, 0, 0)),
                pl.BlockSpec((Cout + 1, K2), lambda n: (0, 0)),
            ],
            out_specs=[
                pl.BlockSpec((1, Cout, P), lambda n: (n, 0, 0)),   # lane-dense (P) stores
                pl.BlockSpec((1, Cout, P), lambda n: (n, 0, 0)),
            ],
            scratch_shapes=[
                pltpu.VMEM((C2, Pp), jnp.float32),     # halo'd [x*m ; m] flat buffer
                pltpu.VMEM((K2, P), MXU_DTYPE),        # im2col buffer (bf16 MXU input)
            ],
        ),
        compiler_params=pltpu.CompilerParams(
            dimension_semantics=("parallel",),          # images -> both TCs on v7x
            vmem_limit_bytes=32 * 1024 * 1024,          # explicit; per-image blocks are ~KB here
        ),
    )(h, hm, sx, sm, w_ext)
    return out, nmask


def _nearest_upsample_nchw(x, out_hw):
    """PyTorch nn.Upsample(size=out_hw, mode='nearest') for NCHW input.

    Integer factors use reshape+broadcast (no gather); non-integer falls back to
    the floor-index gather.
    """
    N, C, Hi, Wi = x.shape
    Ho, Wo = out_hw
    if Ho % Hi == 0 and Wo % Wi == 0:
        fy, fx = Ho // Hi, Wo // Wi
        x6 = jnp.broadcast_to(x[:, :, :, None, :, None], (N, C, Hi, fy, Wi, fx))
        return x6.reshape(N, C, Ho, Wo)
    row_idx = jnp.floor(jnp.arange(Ho) * (Hi / Ho)).astype(jnp.int32)
    col_idx = jnp.floor(jnp.arange(Wo) * (Wi / Wo)).astype(jnp.int32)
    return x[:, :, row_idx, :][:, :, :, col_idx]


def decoder_block_forward(inp, skip_input, mask, skip_mask, weight):
    """Mirrors DecoderBlock.forward (no recurrent conv, skip_layers=True, bn=False).

    inp, mask            : (B, T, Cin,  h,  w)   T = 2*steps+1 = 1
    skip_input, skip_mask: (B, T, Cskip, Hs, Ws)
    weight               : (Cout, Cin+Cskip, KH, KW)
    returns (output, new_mask, recurrent_state=None) with output/new_mask shaped
            (B, T, Cout, Hs, Ws)
    """
    B, T = inp.shape[0], inp.shape[1]
    Cin = inp.shape[2]
    Cskip = skip_input.shape[2]
    Cout = weight.shape[0]
    Hs, Ws = skip_input.shape[-2:]
    P = Hs * Ws

    # sequence_to_batch
    x = inp.reshape((-1,) + inp.shape[2:])
    m = mask.reshape((-1,) + mask.shape[2:])
    sx = skip_input.reshape((-1,) + skip_input.shape[2:])
    sm = skip_mask.reshape((-1,) + skip_mask.shape[2:])
    N = x.shape[0]

    # nearest upsample to the skip resolution (broadcast, no gather)
    h = _nearest_upsample_nchw(x, (Hs, Ws))
    hm = _nearest_upsample_nchw(m, (Hs, Ws))

    # keep NCHW; just flatten spatial onto the lane axis (free reshape).  The channel
    # concat with the skip tensors happens inside the kernel (VMEM), not in HBM.
    h_f = h.reshape(N, Cin, P).astype(jnp.float32)
    hm_f = hm.reshape(N, Cin, P).astype(jnp.float32)
    sx_f = sx.reshape(N, Cskip, P).astype(jnp.float32)
    sm_f = sm.reshape(N, Cskip, P).astype(jnp.float32)

    w_ext = _build_extended_weight(weight, Cin, Cskip)

    out_f, nmask_f = _partial_conv_pallas(h_f, hm_f, sx_f, sm_f, w_ext, Hs, Ws)

    # batch_to_sequence (steps = 0 -> T = 1)
    out = out_f.reshape(B, T, Cout, Hs, Ws)
    nmask = nmask_f.reshape(B, T, Cout, Hs, Ws)
    return out, nmask, None


def _reference_partial_conv(h_nchw, m_nchw, w_pt):
    """Independent pure-JAX (f32) reference for the partial conv block."""
    xm = h_nchw * m_nchw
    dn = ("NCHW", "OIHW", "NCHW")
    conv = lax.conv_general_dilated(xm, w_pt, (1, 1),
                                    [(PAD[0], PAD[0]), (PAD[1], PAD[1])],
                                    dimension_numbers=dn)
    msum = lax.conv_general_dilated(m_nchw, jnp.ones_like(w_pt), (1, 1),
                                    [(PAD[0], PAD[0]), (PAD[1], PAD[1])],
                                    dimension_numbers=dn)
    holes = msum == 0.0
    out = conv / jnp.where(holes, 1.0, msum)
    out = jnp.where(holes, 0.0, out)
    out = jnp.where(out >= 0.0, out, NEG_SLOPE * out)
    nmask = jnp.where(holes, 0.0, 1.0)
    return out, nmask


if __name__ == "__main__":
    key = jax.random.PRNGKey(0)
    k_x, k_m, k_sx, k_sm, k_w = jax.random.split(key, 5)

    B, T = 2, 1                    # steps = 0 -> sequence length 1
    C_in, C_skip, C_out = 4, 4, 4
    h_lo, w_lo = 8, 8              # decoder input spatial size
    H_s, W_s = 16, 16              # skip (upsampled) spatial size

    inp = jax.random.normal(k_x, (B, T, C_in, h_lo, w_lo), jnp.float32)
    mask = (jax.random.uniform(k_m, (B, T, C_in, h_lo, w_lo)) > 0.3).astype(jnp.float32)
    skip_input = jax.random.normal(k_sx, (B, T, C_skip, H_s, W_s), jnp.float32)
    skip_mask = (jax.random.uniform(k_sm, (B, T, C_skip, H_s, W_s)) > 0.3).astype(jnp.float32)

    # PartialConv2d weight: (out_channels, in_channels + skip_channels, KH, KW), bias=False
    weight = 0.1 * jax.random.normal(k_w, (C_out, C_in + C_skip, KH, KW), jnp.float32)

    out, new_mask, state = decoder_block_forward(inp, skip_input, mask, skip_mask, weight)
    out, new_mask = jax.block_until_ready((out, new_mask))

    # sanity-check against an independent f32 lax.conv reference
    x_flat = inp.reshape((-1, C_in, h_lo, w_lo))
    m_flat = mask.reshape((-1, C_in, h_lo, w_lo))
    h_up = _nearest_upsample_nchw(x_flat, (H_s, W_s))
    m_up = _nearest_upsample_nchw(m_flat, (H_s, W_s))
    h_cat = jnp.concatenate([h_up, skip_input.reshape((-1, C_skip, H_s, W_s))], axis=1)
    m_cat = jnp.concatenate([m_up, skip_mask.reshape((-1, C_skip, H_s, W_s))], axis=1)
    ref_out, ref_mask = _reference_partial_conv(h_cat, m_cat, weight)
    ref_out = ref_out.reshape((B, T, C_out, H_s, W_s))
    ref_mask = ref_mask.reshape((B, T, C_out, H_s, W_s))

    assert out.shape == (B, T, C_out, H_s, W_s)
    assert new_mask.shape == (B, T, C_out, H_s, W_s)
    # tolerance accounts for bf16 MXU inputs (f32 accumulation); mask path is exact.
    max_err = float(jnp.max(jnp.abs(out - ref_out)))
    assert jnp.allclose(out, ref_out, atol=2e-2, rtol=2e-2), max_err
    assert jnp.allclose(new_mask, ref_mask)

    print("KERNEL_OK")
</pallas_src>

<mosaic_0001>
module attributes {stable_mosaic.version = 11 : i64} {
  func.func @_pconv_kernel(%arg0: i32, %arg1: memref<1x4x256xf32, #tpu.memory_space<vmem>>, %arg2: memref<1x4x256xf32, #tpu.memory_space<vmem>>, %arg3: memref<1x4x256xf32, #tpu.memory_space<vmem>>, %arg4: memref<1x4x256xf32, #tpu.memory_space<vmem>>, %arg5: memref<5x144xbf16, #tpu.memory_space<vmem>>, %arg6: memref<1x4x256xf32, #tpu.memory_space<vmem>>, %arg7: memref<1x4x256xf32, #tpu.memory_space<vmem>>, %arg8: memref<16x290xf32, #tpu.memory_space<vmem>>, %arg9: memref<144x256xbf16, #tpu.memory_space<vmem>>) attributes {dimension_semantics = [#tpu.dimension_semantics<parallel>], iteration_bounds = array<i64: 2>, scalar_prefetch = 0 : i64, scratch_operands = 2 : i64, tpu.core_type = #tpu.core_type<tc>, window_params = [{transform_indices = @transform_0, window_bounds = array<i64: 1, 4, 256>}, {transform_indices = @transform_1, window_bounds = array<i64: 1, 4, 256>}, {transform_indices = @transform_2, window_bounds = array<i64: 1, 4, 256>}, {transform_indices = @transform_3, window_bounds = array<i64: 1, 4, 256>}, {pipeline_mode = #tpu.pipeline_mode<synchronous>, transform_indices = @transform_4, window_bounds = array<i64: 5, 144>}, {transform_indices = @transform_5, window_bounds = array<i64: 1, 4, 256>}, {transform_indices = @transform_6, window_bounds = array<i64: 1, 4, 256>}]} {
    %cst = arith.constant 0.000000e+00 : f32
    %0 = vector.broadcast %cst : f32 to vector<16x290xf32>
    %c0 = arith.constant 0 : index
    %c0_0 = arith.constant 0 : index
    %1 = vector.load %arg8[%c0, %c0_0] : memref<16x290xf32, #tpu.memory_space<vmem>>, vector<16x290xf32>
    tpu.vector_store %arg8[%c0, %c0_0], %0 {strides = array<i32>} : memref<16x290xf32, #tpu.memory_space<vmem>>, vector<16x290xf32>,
    %c0_1 = arith.constant 0 : index
    %c0_2 = arith.constant 0 : index
    %c0_3 = arith.constant 0 : index
    %2 = vector.load %arg1[%c0_1, %c0_2, %c0_3] : memref<1x4x256xf32, #tpu.memory_space<vmem>>, vector<1x4x256xf32>
    %3 = vector.shape_cast %2 : vector<1x4x256xf32> to vector<4x256xf32>
    %c0_4 = arith.constant 0 : index
    %c0_5 = arith.constant 0 : index
    %c0_6 = arith.constant 0 : index
    %4 = vector.load %arg2[%c0_4, %c0_5, %c0_6] : memref<1x4x256xf32, #tpu.memory_space<vmem>>, vector<1x4x256xf32>
    %5 = vector.shape_cast %4 : vector<1x4x256xf32> to vector<4x256xf32>
    %6 = arith.mulf %3, %5 : vector<4x256xf32>
    %c0_7 = arith.constant 0 : index
    %c17 = arith.constant 17 : index
    %7 = vector.load %arg8[%c0_7, %c17] : memref<16x290xf32, #tpu.memory_space<vmem>>, vector<4x256xf32>
    tpu.vector_store %arg8[%c0_7, %c17], %6 {strides = array<i32>} : memref<16x290xf32, #tpu.memory_space<vmem>>, vector<4x256xf32>,
    %c0_8 = arith.constant 0 : index
    %c0_9 = arith.constant 0 : index
    %c0_10 = arith.constant 0 : index
    %8 = vector.load %arg3[%c0_8, %c0_9, %c0_10] : memref<1x4x256xf32, #tpu.memory_space<vmem>>, vector<1x4x256xf32>
    %9 = vector.shape_cast %8 : vector<1x4x256xf32> to vector<4x256xf32>
    %c0_11 = arith.constant 0 : index
    %c0_12 = arith.constant 0 : index
    %c0_13 = arith.constant 0 : index
    %10 = vector.load %arg4[%c0_11, %c0_12, %c0_13] : memref<1x4x256xf32, #tpu.memory_space<vmem>>, vector<1x4x256xf32>
    %11 = vector.shape_cast %10 : vector<1x4x256xf32> to vector<4x256xf32>
    %12 = arith.mulf %9, %11 : vector<4x256xf32>
    %c4 = arith.constant 4 : index
    %c17_14 = arith.constant 17 : index
    %13 = vector.load %arg8[%c4, %c17_14] : memref<16x290xf32, #tpu.memory_space<vmem>>, vector<4x256xf32>
    tpu.vector_store %arg8[%c4, %c17_14], %12 {strides = array<i32>} : memref<16x290xf32, #tpu.memory_space<vmem>>, vector<4x256xf32>,
    %c0_15 = arith.constant 0 : index
    %c0_16 = arith.constant 0 : index
    %c0_17 = arith.constant 0 : index
    %14 = vector.load %arg2[%c0_15, %c0_16, %c0_17] : memref<1x4x256xf32, #tpu.memory_space<vmem>>, vector<1x4x256xf32>
    %15 = vector.shape_cast %14 : vector<1x4x256xf32> to vector<4x256xf32>
    %c8 = arith.constant 8 : index
    %c17_18 = arith.constant 17 : index
    %16 = vector.load %arg8[%c8, %c17_18] : memref<16x290xf32, #tpu.memory_space<vmem>>, vector<4x256xf32>
    tpu.vector_store %arg8[%c8, %c17_18], %15 {strides = array<i32>} : memref<16x290xf32, #tpu.memory_space<vmem>>, vector<4x256xf32>,
    %c0_19 = arith.constant 0 : index
    %c0_20 = arith.constant 0 : index
    %c0_21 = arith.constant 0 : index
    %17 = vector.load %arg4[%c0_19, %c0_20, %c0_21] : memref<1x4x256xf32, #tpu.memory_space<vmem>>, vector<1x4x256xf32>
    %18 = vector.shape_cast %17 : vector<1x4x256xf32> to vector<4x256xf32>
    %c12 = arith.constant 12 : index
    %c17_22 = arith.constant 17 : index
    %19 = vector.load %arg8[%c12, %c17_22] : memref<16x290xf32, #tpu.memory_space<vmem>>, vector<4x256xf32>
    tpu.vector_store %arg8[%c12, %c17_22], %18 {strides = array<i32>} : memref<16x290xf32, #tpu.memory_space<vmem>>, vector<4x256xf32>,
    %20 = tpu.iota {dimensions = array<i32: 1>} : vector<1x256xi32>
    %c16_i32 = arith.constant 16 : i32
    %c0_i32 = arith.constant 0 : i32
    %21 = arith.cmpi eq, %c16_i32, %c0_i32 : i32
    %c1_i32 = arith.constant 1 : i32
    %22 = arith.select %21, %c1_i32, %c16_i32 : i32
    %23 = vector.broadcast %22 : i32 to vector<1x256xi32>
    %24 = arith.remsi %20, %23 : vector<1x256xi32>
    %c0_i32_23 = arith.constant 0 : i32
    %25 = vector.broadcast %c0_i32_23 : i32 to vector<1x256xi32>
    %26 = arith.cmpi ne, %24, %25 : vector<1x256xi32>
    %c0_i32_24 = arith.constant 0 : i32
    %27 = vector.broadcast %c0_i32_24 : i32 to vector<1x256xi32>
    %28 = arith.cmpi slt, %24, %27 : vector<1x256xi32>
    %c0_i32_25 = arith.constant 0 : i32
    %29 = arith.cmpi slt, %22, %c0_i32_25 : i32
    %30 = vector.broadcast %29 : i1 to vector<1x256xi1>
    %31 = vector.broadcast %30 : vector<1x256xi1> to vector<1x256xi1>
    %32 = arith.xori %28, %31 : vector<1x256xi1>
    %33 = arith.andi %32, %26 : vector<1x256xi1>
    %34 = vector.broadcast %22 : i32 to vector<1x256xi32>
    %35 = arith.addi %24, %34 : vector<1x256xi32>
    %36 = arith.select %33, %35, %24 : vector<1x256xi1>, vector<1x256xi32>
    %c0_i32_26 = arith.constant 0 : i32
    %37 = vector.broadcast %c0_i32_26 : i32 to vector<1x256xi32>
    %38 = arith.cmpi ne, %36, %37 : vector<1x256xi32>
    %39 = arith.extui %38 : vector<1x256xi1> to vector<1x256xi32>
    %40 = arith.sitofp %39 : vector<1x256xi32> to vector<1x256xf32>
    %c15_i32 = arith.constant 15 : i32
    %41 = vector.broadcast %c15_i32 : i32 to vector<1x256xi32>
    %42 = arith.cmpi ne, %36, %41 : vector<1x256xi32>
    %43 = arith.extui %42 : vector<1x256xi1> to vector<1x256xi32>
    %44 = arith.sitofp %43 : vector<1x256xi32> to vector<1x256xf32>
    %c0_27 = arith.constant 0 : index
    %c0_28 = arith.constant 0 : index
    %45 = vector.load %arg8[%c0_27, %c0_28] : memref<16x290xf32, #tpu.memory_space<vmem>>, vector<16x256xf32>
    %46 = vector.broadcast %40 : vector<1x256xf32> to vector<16x256xf32>
    %47 = arith.mulf %45, %46 : vector<16x256xf32>
    %48 = arith.truncf %47 : vector<16x256xf32> to vector<16x256xbf16>
    %c0_29 = arith.constant 0 : index
    %c0_30 = arith.constant 0 : index
    %49 = vector.load %arg9[%c0_29, %c0_30] : memref<144x256xbf16, #tpu.memory_space<vmem>>, vector<16x256xbf16>
    tpu.vector_store %arg9[%c0_29, %c0_30], %48 {strides = array<i32>} : memref<144x256xbf16, #tpu.memory_space<vmem>>, vector<16x256xbf16>,
    %c0_31 = arith.constant 0 : index
    %c1 = arith.constant 1 : index
    %50 = vector.load %arg8[%c0_31, %c1] : memref<16x290xf32, #tpu.memory_space<vmem>>, vector<16x256xf32>
    %51 = arith.truncf %50 : vector<16x256xf32> to vector<16x256xbf16>
    %c16 = arith.constant 16 : index
    %c0_32 = arith.constant 0 : index
    %52 = vector.load %arg9[%c16, %c0_32] : memref<144x256xbf16, #tpu.memory_space<vmem>>, vector<16x256xbf16>
    tpu.vector_store %arg9[%c16, %c0_32], %51 {strides = array<i32>} : memref<144x256xbf16, #tpu.memory_space<vmem>>, vector<16x256xbf16>,
    %c0_33 = arith.constant 0 : index
    %c2 = arith.constant 2 : index
    %53 = vector.load %arg8[%c0_33, %c2] : memref<16x290xf32, #tpu.memory_space<vmem>>, vector<16x256xf32>
    %54 = vector.broadcast %44 : vector<1x256xf32> to vector<16x256xf32>
    %55 = arith.mulf %53, %54 : vector<16x256xf32>
    %56 = arith.truncf %55 : vector<16x256xf32> to vector<16x256xbf16>
    %c32 = arith.constant 32 : index
    %c0_34 = arith.constant 0 : index
    %57 = vector.load %arg9[%c32, %c0_34] : memref<144x256xbf16, #tpu.memory_space<vmem>>, vector<16x256xbf16>
    tpu.vector_store %arg9[%c32, %c0_34], %56 {strides = array<i32>} : memref<144x256xbf16, #tpu.memory_space<vmem>>, vector<16x256xbf16>,
    %c0_35 = arith.constant 0 : index
    %c16_36 = arith.constant 16 : index
    %58 = vector.load %arg8[%c0_35, %c16_36] : memref<16x290xf32, #tpu.memory_space<vmem>>, vector<16x256xf32>
    %59 = vector.broadcast %40 : vector<1x256xf32> to vector<16x256xf32>
    %60 = arith.mulf %58, %59 : vector<16x256xf32>
    %61 = arith.truncf %60 : vector<16x256xf32> to vector<16x256xbf16>
    %c48 = arith.constant 48 : index
    %c0_37 = arith.constant 0 : index
    %62 = vector.load %arg9[%c48, %c0_37] : memref<144x256xbf16, #tpu.memory_space<vmem>>, vector<16x256xbf16>
    tpu.vector_store %arg9[%c48, %c0_37], %61 {strides = array<i32>} : memref<144x256xbf16, #tpu.memory_space<vmem>>, vector<16x256xbf16>,
    %c0_38 = arith.constant 0 : index
    %c17_39 = arith.constant 17 : index
    %63 = vector.load %arg8[%c0_38, %c17_39] : memref<16x290xf32, #tpu.memory_space<vmem>>, vector<16x256xf32>
    %64 = arith.truncf %63 : vector<16x256xf32> to vector<16x256xbf16>
    %c64 = arith.constant 64 : index
    %c0_40 = arith.constant 0 : index
    %65 = vector.load %arg9[%c64, %c0_40] : memref<144x256xbf16, #tpu.memory_space<vmem>>, vector<16x256xbf16>
    tpu.vector_store %arg9[%c64, %c0_40], %64 {strides = array<i32>} : memref<144x256xbf16, #tpu.memory_space<vmem>>, vector<16x256xbf16>,
    %c0_41 = arith.constant 0 : index
    %c18 = arith.constant 18 : index
    %66 = vector.load %arg8[%c0_41, %c18] : memref<16x290xf32, #tpu.memory_space<vmem>>, vector<16x256xf32>
    %67 = vector.broadcast %44 : vector<1x256xf32> to vector<16x256xf32>
    %68 = arith.mulf %66, %67 : vector<16x256xf32>
    %69 = arith.truncf %68 : vector<16x256xf32> to vector<16x256xbf16>
    %c80 = arith.constant 80 : index
    %c0_42 = arith.constant 0 : index
    %70 = vector.load %arg9[%c80, %c0_42] : memref<144x256xbf16, #tpu.memory_space<vmem>>, vector<16x256xbf16>
    tpu.vector_store %arg9[%c80, %c0_42], %69 {strides = array<i32>} : memref<144x256xbf16, #tpu.memory_space<vmem>>, vector<16x256xbf16>,
    %c0_43 = arith.constant 0 : index
    %c32_44 = arith.constant 32 : index
    %71 = vector.load %arg8[%c0_43, %c32_44] : memref<16x290xf32, #tpu.memory_space<vmem>>, vector<16x256xf32>
    %72 = vector.broadcast %40 : vector<1x256xf32> to vector<16x256xf32>
    %73 = arith.mulf %71, %72 : vector<16x256xf32>
    %74 = arith.truncf %73 : vector<16x256xf32> to vector<16x256xbf16>
    %c96 = arith.constant 96 : index
    %c0_45 = arith.constant 0 : index
    %75 = vector.load %arg9[%c96, %c0_45] : memref<144x256xbf16, #tpu.memory_space<vmem>>, vector<16x256xbf16>
    tpu.vector_store %arg9[%c96, %c0_45], %74 {strides = array<i32>} : memref<144x256xbf16, #tpu.memory_space<vmem>>, vector<16x256xbf16>,
    %c0_46 = arith.constant 0 : index
    %c33 = arith.constant 33 : index
    %76 = vector.load %arg8[%c0_46, %c33] : memref<16x290xf32, #tpu.memory_space<vmem>>, vector<16x256xf32>
    %77 = arith.truncf %76 : vector<16x256xf32> to vector<16x256xbf16>
    %c112 = arith.constant 112 : index
    %c0_47 = arith.constant 0 : index
    %78 = vector.load %arg9[%c112, %c0_47] : memref<144x256xbf16, #tpu.memory_space<vmem>>, vector<16x256xbf16>
    tpu.vector_store %arg9[%c112, %c0_47], %77 {strides = array<i32>} : memref<144x256xbf16, #tpu.memory_space<vmem>>, vector<16x256xbf16>,
    %c0_48 = arith.constant 0 : index
    %c34 = arith.constant 34 : index
    %79 = vector.load %arg8[%c0_48, %c34] : memref<16x290xf32, #tpu.memory_space<vmem>>, vector<16x256xf32>
    %80 = vector.broadcast %44 : vector<1x256xf32> to vector<16x256xf32>
    %81 = arith.mulf %79, %80 : vector<16x256xf32>
    %82 = arith.truncf %81 : vector<16x256xf32> to vector<16x256xbf16>
    %c128 = arith.constant 128 : index
    %c0_49 = arith.constant 0 : index
    %83 = vector.load %arg9[%c128, %c0_49] : memref<144x256xbf16, #tpu.memory_space<vmem>>, vector<16x256xbf16>
    tpu.vector_store %arg9[%c128, %c0_49], %82 {strides = array<i32>} : memref<144x256xbf16, #tpu.memory_space<vmem>>, vector<16x256xbf16>,
    %c0_50 = arith.constant 0 : index
    %c0_51 = arith.constant 0 : index
    %84 = vector.load %arg5[%c0_50, %c0_51] : memref<5x144xbf16, #tpu.memory_space<vmem>>, vector<5x144xbf16>
    %c0_52 = arith.constant 0 : index
    %c0_53 = arith.constant 0 : index
    %85 = vector.load %arg9[%c0_52, %c0_53] : memref<144x256xbf16, #tpu.memory_space<vmem>>, vector<144x256xbf16>
    %cst_54 = arith.constant dense<0.000000e+00> : vector<5x256xf32>
    %86 = tpu.matmul %84, %85, %cst_54 {dimension_numbers = #tpu.dot_dimension_numbers<[1], [0], [0], [1], [0, 0, 1, 1], [], []>} : vector<5x144xbf16>, vector<144x256xbf16>, vector<5x256xf32> -> vector<5x256xf32>
    %87 = vector.extract_strided_slice %86 {offsets = [0, 0], sizes = [4, 256], strides = [1, 1]} : vector<5x256xf32> to vector<4x256xf32>
    %88 = vector.extract_strided_slice %86 {offsets = [4, 0], sizes = [1, 256], strides = [1, 1]} : vector<5x256xf32> to vector<1x256xf32>
    %cst_55 = arith.constant 0.000000e+00 : f32
    %89 = vector.broadcast %cst_55 : f32 to vector<1x256xf32>
    %90 = arith.cmpf oeq, %88, %89 : vector<1x256xf32>
    %cst_56 = arith.constant 1.000000e+00 : f32
    %91 = vector.broadcast %cst_56 : f32 to vector<1x256xf32>
    %92 = arith.select %90, %91, %88 : vector<1x256xi1>, vector<1x256xf32>
    %93 = tpu.reciprocal %92 {approx = true} : vector<1x256xf32> -> vector<1x256xf32>
    %94 = arith.mulf %92, %93 : vector<1x256xf32>
    %cst_57 = arith.constant 2.000000e+00 : f32
    %95 = vector.broadcast %cst_57 : f32 to vector<1x256xf32>
    %96 = arith.subf %95, %94 : vector<1x256xf32>
    %97 = arith.mulf %93, %96 : vector<1x256xf32>
    %98 = vector.broadcast %97 : vector<1x256xf32> to vector<4x256xf32>
    %99 = arith.mulf %87, %98 : vector<4x256xf32>
    %cst_58 = arith.constant 0.000000e+00 : f32
    %100 = vector.shape_cast %90 : vector<1x256xi1> to vector<1x256xi1>
    %101 = vector.broadcast %100 : vector<1x256xi1> to vector<4x256xi1>
    %102 = vector.broadcast %cst_58 : f32 to vector<4x256xf32>
    %103 = arith.select %101, %102, %99 : vector<4x256xi1>, vector<4x256xf32>
    %cst_59 = arith.constant 0.000000e+00 : f32
    %104 = vector.broadcast %cst_59 : f32 to vector<4x256xf32>
    %105 = arith.cmpf oge, %103, %104 : vector<4x256xf32>
    %cst_60 = arith.constant 0.00999999977 : f32
    %106 = vector.broadcast %cst_60 : f32 to vector<4x256xf32>
    %107 = arith.mulf %106, %103 : vector<4x256xf32>
    %108 = arith.select %105, %103, %107 : vector<4x256xi1>, vector<4x256xf32>
    %c0_61 = arith.constant 0 : index
    %c0_62 = arith.constant 0 : index
    %c0_63 = arith.constant 0 : index
    %109 = vector.load %arg6[%c0_61, %c0_62, %c0_63] : memref<1x4x256xf32, #tpu.memory_space<vmem>>, vector<1x4x256xf32>
    %110 = vector.shape_cast %109 : vector<1x4x256xf32> to vector<4x256xf32>
    %111 = vector.shape_cast %108 : vector<4x256xf32> to vector<1x4x256xf32>
    tpu.vector_store %arg6[%c0_61, %c0_62, %c0_63], %111 {strides = array<i32>} : memref<1x4x256xf32, #tpu.memory_space<vmem>>, vector<1x4x256xf32>,
    %cst_64 = arith.constant 0.000000e+00 : f32
    %cst_65 = arith.constant 1.000000e+00 : f32
    %112 = vector.broadcast %cst_64 : f32 to vector<1x256xf32>
    %113 = vector.broadcast %cst_65 : f32 to vector<1x256xf32>
    %114 = arith.select %90, %112, %113 : vector<1x256xi1>, vector<1x256xf32>
    %115 = vector.shape_cast %114 : vector<1x256xf32> to vector<1x256xf32>
    %116 = vector.broadcast %115 : vector<1x256xf32> to vector<4x256xf32>
    %c0_66 = arith.constant 0 : index
    %c0_67 = arith.constant 0 : index
    %c0_68 = arith.constant 0 : index
    %117 = vector.load %arg7[%c0_66, %c0_67, %c0_68] : memref<1x4x256xf32, #tpu.memory_space<vmem>>, vector<1x4x256xf32>
    %118 = vector.shape_cast %117 : vector<1x4x256xf32> to vector<4x256xf32>
    %119 = vector.shape_cast %116 : vector<4x256xf32> to vector<1x4x256xf32>
    tpu.vector_store %arg7[%c0_66, %c0_67, %c0_68], %119 {strides = array<i32>} : memref<1x4x256xf32, #tpu.memory_space<vmem>>, vector<1x4x256xf32>,
    return
  }
  func.func @transform_0(%arg0: i32) -> (i32, i32, i32) {
    %c0_i32 = arith.constant 0 : i32
    %c0_i32_0 = arith.constant 0 : i32
    %c0_i32_1 = arith.constant 0 : i32
    return %arg0, %c0_i32, %c0_i32_0 : i32, i32, i32
  }
  func.func @transform_1(%arg0: i32) -> (i32, i32, i32) {
    %c0_i32 = arith.constant 0 : i32
    %c0_i32_0 = arith.constant 0 : i32
    %c0_i32_1 = arith.constant 0 : i32
    return %arg0, %c0_i32, %c0_i32_0 : i32, i32, i32
  }
  func.func @transform_2(%arg0: i32) -> (i32, i32, i32) {
    %c0_i32 = arith.constant 0 : i32
    %c0_i32_0 = arith.constant 0 : i32
    %c0_i32_1 = arith.constant 0 : i32
    return %arg0, %c0_i32, %c0_i32_0 : i32, i32, i32
  }
  func.func @transform_3(%arg0: i32) -> (i32, i32, i32) {
    %c0_i32 = arith.constant 0 : i32
    %c0_i32_0 = arith.constant 0 : i32
    %c0_i32_1 = arith.constant 0 : i32
    return %arg0, %c0_i32, %c0_i32_0 : i32, i32, i32
  }
  func.func @transform_4(%arg0: i32) -> (i32, i32) {
    %c0_i32 = arith.constant 0 : i32
    %c0_i32_0 = arith.constant 0 : i32
    %c0_i32_1 = arith.constant 0 : i32
    return %c0_i32, %c0_i32_0 : i32, i32
  }
  func.func @transform_5(%arg0: i32) -> (i32, i32, i32) {
    %c0_i32 = arith.constant 0 : i32
    %c0_i32_0 = arith.constant 0 : i32
    %c0_i32_1 = arith.constant 0 : i32
    return %arg0, %c0_i32, %c0_i32_0 : i32, i32, i32
  }
  func.func @transform_6(%arg0: i32) -> (i32, i32, i32) {
    %c0_i32 = arith.constant 0 : i32
    %c0_i32_0 = arith.constant 0 : i32
    %c0_i32_1 = arith.constant 0 : i32
    return %arg0, %c0_i32, %c0_i32_0 : i32, i32, i32
  }
}

</mosaic_0001>

<bundles_post_ra>
// kernel: tpu_custom_call.1
= control target key start
LH: loop header
LB: loop body
LE: loop exit
PB: predicated region body
PF: predicated region fallthrough
CT: control target
= control target key end

     0   :  { %s2438_s0 = inlined_call_operand.hbm [shape: f32[2,4,256], index: 0, kind: input, shape index: {}]   ;;  %s2439_s1 = inlined_call_operand.hbm [shape: f32[2,4,256], index: 1, kind: input, shape index: {}]   ;;  %s2440_s2 = inlined_call_operand.hbm [shape: f32[2,4,256], index: 2, kind: input, shape index: {}]   ;;  %s2441_s3 = inlined_call_operand.hbm [shape: f32[2,4,256], index: 3, kind: input, shape index: {}]   ;;  %s2442_s4 = inlined_call_operand.hbm [shape: bf16[5,144], index: 4, kind: input, shape index: {}]   ;;  %s2443_s5 = inlined_call_operand.hbm [shape: f32[2,4,256], index: 5, kind: output, shape index: {0}]   ;;  %s2444_s6 = inlined_call_operand.hbm [shape: f32[2,4,256], index: 6, kind: output, shape index: {1}]  }
   0x1   :  { %2454 = sst [smem:[#allocation25_spill]] %s2438_s0 }
   0x2   :  { %2455 = sst [smem:[#allocation26_spill]] %s2439_s1 }
   0x3   :  { %2456 = sst [smem:[#allocation27_spill]] %s2442_s4 }
   0x4   :  { %12 = vsyncpa [#allocation5], 0 }
   0x5   :  { %14 = vsyncpa [#allocation5 + $0x1], 0 }
   0x6   :  { %15 = vsyncpa [#allocation8], 0 }
   0x7   :  { %17 = vsyncpa [#allocation8 + $0x1], 0 }
   0x8   :  { %18 = vsyncpa [#allocation11], 0 }
   0x9   :  { %20 = vsyncpa [#allocation11 + $0x1], 0 }
   0xa   :  { %21 = vsyncpa [#allocation6], 0 }
   0xb   :  { %23 = vsyncpa [#allocation6 + $0x1], 0 }
   0xc   :  { %24 = vsyncpa [#allocation15], 0 }
   0xd   :  { %26 = vsyncpa [#allocation15 + $0x1], 0  ;;  %s1956_s21 = smov 0   ;;  %s1958_s22 = smov 0  }
   0xe   :  { %s1960_s23 = smov 0   ;;  %s1962_s24 = smov 0  }
   0xf LB: > { %s1977_s25 = sadd.s32 4294967295, %s1895_s24   ;;  %s1391_s26 = sadd.s32 4294967294, %s1895_s24   ;;  %s1895_s24 = sphi %s1962_s24, %s2482_s24   ;;  %s1891_s23 = sphi %s1960_s23, %s2486_s23   ;;  %s1887_s22 = sphi %s1958_s22, %s2485_s22   ;;  %s1883_s21 = sphi %s1956_s21, %s2484_s21  }
  0x10   : > { %s1981_s27 = sadd.s32 1, %s1895_s24   ;;  %s39_s28 = sadd.s32 1, %s1891_s23 }
  0x11   : > { %2457 = sst [smem:[#allocation22_spill]] %s1981_s27  ;;  %s36_s29 = ssub.s32 %s1895_s24, %s1981_s27 }
  0x12   : > { %p46_p0 = scmp.ne.s32.totalorder %s1891_s23, %s1887_s22  ;;  %p37_p1 = scmp.eq.s32.totalorder %s36_s29, 0 }
  0x13   : > { %p47_p2 = scmp.eq.s32.totalorder %s1895_s24, 0  ;;  %p52_p3 = scmp.ne.s32.totalorder %s1887_s22, %s1883_s21 }
  0x14   : > { %p2445_p4 = scmp.eq.s32.totalorder %s1977_s25, 0  ;;  %p175_p7 = scmp.eq.s32.totalorder %s1977_s25, 1 }
  0x15   : > { %s1993_s30 = scalar_select %p37_p1, %s1891_s23, %s39_s28  }
  0x16   : > { %p1995_p5 = por %p47_p2, %p46_p0  ;;  %p2001_p6 = por %p2445_p4, %p52_p3 }
  0x17   : > { %2458 = sst [smem:[#allocation23_spill]] %s1993_s30  ;;  %p181_p8 = scmp.eq.s32.totalorder %s1391_s26, 1 }
  0x18   : > { %s2460_s8 = scalar_select %p2001_p6, 1, 0 }
  0x19   : > { %p1392_p9 = scmp.ge.s32.totalorder %s1895_s24, 1  ;;  %p214_p10 = scmp.lt.s32.totalorder %s1895_s24, 3 }
  0x1a   : > { %p2008_p11 = por %p175_p7, %p46_p0  ;;  %p2012_p12 = por %p181_p8, %p52_p3 }
  0x1b   : > { %p2016_p13 = pnand %p1392_p9, %p214_p10  ;;  %s1897_s12 = smov [#allocation12]  }
  0x1c   : > { %s2461_s9 = scalar_select %p2008_p11, 1, 0 }
  0x1d   : > { %s2462_s10 = scalar_select %p2012_p12, 1, 0 }
  0x1e   : > { %s2464_s11 = scalar_select %p2016_p13, 1, 0 }
  0x1f   : > { %2463 = sst [smem:[#allocation24_spill]] %s2462_s10  ;;  %p1540_p2 = pneg %p2016_p13 }
  0x20   : > { %s227_s13 = sshll.u32 %s1897_s12, 4  ;;  %p1565_p4 = scmp.lt.s32.totalorder %s1895_s24, 2  ;;  %s228_s13 = int_to_ptr.vmem [resolvable:$true] %s227_s13 }
  0x21   : > { %p2465_p0 = scmp.eq.s32.totalorder %s1977_s25, 0  ;;  %s2447_s15 = sand.u32 1, %s1891_s23  }
  0x22   : > { %s2033_s16 = sshll.u32 %s2447_s15, 3  ;;  %s2036_s17 = sshll.u32 %s1895_s24, 7 }
  0x23   : > { %p2026_p7 = pnand %p1540_p2, %p2465_p0  ;;  %p2040_p3 = pnand %p1565_p4, %p1995_p5 }
  0x24   : > { %s1662_s19 = scalar_lea.vmem %s228_s13, 128  ;;  %p1670_p0 = scmp.lt.s32.totalorder %s228_s13, %s228_s13 }
  0x25   : > { %p1653_p8 = pneg %p2026_p7  ;;  %p1663_p9 = scmp.ne.s32.totalorder %s228_s13, %s1662_s19 }
  0x26   : > { %p1671_p1 = scmp.lt.s32.totalorder %s1662_s19, %s1662_s19 }
  0x27   : > { %p1665_p10 = pnand %p1663_p9, %p1653_p8 }
  0x28   : > { %p1672_p12 = por %p1671_p1, %p1670_p0 }
  0x29   : > { %p1666_p2 = pneg %p1665_p10 }
  0x2b   : > { %p1673_p11 = pnand %p1672_p12, %p1666_p2 }
  0x2d   : > { %1676 = shalt.err (!%p1673_p11)
}
  0x2e   : > { %s2468_s4 = sld [smem:[#allocation27_spill]]  ;;  %s2448_s28 = sand.u32 1, %s1895_s24  }
  0x2f   : > { %s2469_s1 = sld [smem:[#allocation26_spill]]  ;;  %s261_s19 = scalar_lea.vmem [#allocation7], %s2033_s16 }
  0x30   : > { %s269_s14 = sshll.u32 %s261_s19, 4  ;;  %s2061_s20 = scalar_lea.sflag [#allocation8], %s2448_s28  ;;  %s270_s14 = int_to_ptr.vmem [resolvable:$true] %s269_s14 }
  0x31   : > { %p2067_p5 = pneg %p2040_p3 }
  0x34   : > { %1543 = dma.hbm_to_vmem [thread:$0]  (!%p2026_p7), %s2468_s4, 128, %s228_s13, [#allocation11]  }
  0x35   : > { %s2056_s12 = scalar_lea.hbm %s2469_s1, %s2036_s17  ;;  %s1682_s15 = scalar_lea.hbm %s2469_s1, 256 }
  0x36   : > { %s1677_s26 = scalar_lea.hbm %s2056_s12, 128  ;;  %p1683_p1 = scmp.lt.s32.totalorder %s2056_s12, %s2469_s1 }
  0x37   : > { %p1678_p4 = scmp.ne.s32.totalorder %s2056_s12, %s1677_s26  ;;  %p1684_p7 = scmp.lt.s32.totalorder %s1682_s15, %s1677_s26 }
  0x39   : > { %p1680_p11 = pnand %p2067_p5, %p1678_p4  ;;  %p1685_p8 = por %p1684_p7, %p1683_p1 }
  0x3b   : > { %p1681_p12 = pneg %p1680_p11 }
  0x3d   : > { %p1686_p9 = pnand %p1685_p8, %p1681_p12 }
  0x3f   : > { %1689 = shalt.err (!%p1686_p9)
}
  0x40   : > { %s1690_s28 = scalar_lea.vmem %s270_s14, 128  ;;  %s1898_s30 = smov [#allocation7]  }
  0x41   : > { %p1691_p10 = scmp.ne.s32.totalorder %s270_s14, %s1690_s28  ;;  %s1695_s27 = sshll.u32 %s1898_s30, 4  ;;  %s1696_s27 = int_to_ptr.vmem [resolvable:$false] %s1695_s27 }
  0x42   : > { %s1697_s10 = scalar_lea.vmem %s1696_s27, 256  ;;  %p1698_p4 = scmp.lt.s32.totalorder %s270_s14, %s1696_s27 }
  0x43   : > { %p1693_p2 = pnand %p1691_p10, %p2067_p5  ;;  %p1699_p11 = scmp.lt.s32.totalorder %s1697_s10, %s1690_s28 }
  0x45   : > { %p1694_p0 = pneg %p1693_p2  ;;  %p1700_p6 = por %p1699_p11, %p1698_p4 }
  0x47   : > { %p1701_p13 = pnand %p1700_p6, %p1694_p0 }
  0x49   : > { %1704 = shalt.err (!%p1701_p13)
}
  0x4a   : > { %1550 = dma.hbm_to_vmem [thread:$0]  (!%p2040_p3), %s2056_s12, 128, %s270_s14, %s2061_s20  }
  0x4b   : > { %s2471_s0 = sld [smem:[#allocation25_spill]]  ;;  %s242_s27 = scalar_lea.vmem [#allocation4], %s2033_s16 }
  0x4c   : > { %s250_s10 = sshll.u32 %s242_s27, 4  ;;  %s2472_s28 = sand.u32 1, %s1891_s23   ;;  %s251_s10 = int_to_ptr.vmem [resolvable:$true] %s250_s10 }
  0x4d   : > { %s239_s26 = scalar_lea.sflag [#allocation5], %s2472_s28 }
  0x51   : > { %s2090_s30 = scalar_lea.hbm %s2471_s0, %s2036_s17  ;;  %s1710_s14 = scalar_lea.hbm %s2471_s0, 256 }
  0x52   : > { %s1705_s29 = scalar_lea.hbm %s2090_s30, 128  ;;  %p1711_p1 = scmp.lt.s32.totalorder %s2090_s30, %s2471_s0 }
  0x53   : > { %p1706_p6 = scmp.ne.s32.totalorder %s2090_s30, %s1705_s29  ;;  %p1712_p7 = scmp.lt.s32.totalorder %s1710_s14, %s1705_s29 }
  0x55   : > { %p1708_p13 = pnand %p1706_p6, %p2067_p5  ;;  %p1713_p8 = por %p1712_p7, %p1711_p1 }
  0x57   : > { %p1709_p12 = pneg %p1708_p13 }
  0x59   : > { %p1714_p9 = pnand %p1713_p8, %p1709_p12 }
  0x5b   : > { %1717 = shalt.err (!%p1714_p9)
}
  0x5c   : > { %s1718_s15 = scalar_lea.vmem %s251_s10, 128  ;;  %s1899_s27 = smov [#allocation4]  }
  0x5d   : > { %p1719_p10 = scmp.ne.s32.totalorder %s251_s10, %s1718_s15  ;;  %s1723_s28 = sshll.u32 %s1899_s27, 4  ;;  %s1724_s28 = int_to_ptr.vmem [resolvable:$false] %s1723_s28 }
  0x5e   : > { %s1725_s1 = scalar_lea.vmem %s1724_s28, 256  ;;  %p1726_p4 = scmp.lt.s32.totalorder %s251_s10, %s1724_s28 }
  0x5f   : > { %p1721_p2 = pnand %p1719_p10, %p2067_p5  ;;  %p1727_p11 = scmp.lt.s32.totalorder %s1725_s1, %s1718_s15 }
  0x61   : > { %p1722_p0 = pneg %p1721_p2  ;;  %p1728_p6 = por %p1727_p11, %p1726_p4 }
  0x63   : > { %p1729_p13 = pnand %p1728_p6, %p1722_p0 }
  0x65   : > { %1732 = shalt.err (!%p1729_p13)
}
  0x66   : > { %1547 = dma.hbm_to_vmem [thread:$0]  (!%p2040_p3), %s2090_s30, 128, %s251_s10, %s239_s26  }
  0x67   : > { %s286_s12 = scalar_lea.hbm %s2440_s2, %s2036_s17  ;;  %s280_s14 = scalar_lea.vmem [#allocation9], %s2033_s16 }
  0x68   : > { %s288_s19 = sshll.u32 %s280_s14, 4  ;;  %s1733_s4 = scalar_lea.hbm %s286_s12, 128  ;;  %s289_s19 = int_to_ptr.vmem [resolvable:$true] %s288_s19 }
  0x69   : > { %p1734_p12 = scmp.ne.s32.totalorder %s286_s12, %s1733_s4  ;;  %s1738_s27 = scalar_lea.hbm %s2440_s2, 256 }
  0x6a   : > { %p1739_p8 = scmp.lt.s32.totalorder %s286_s12, %s2440_s2  ;;  %p1740_p9 = scmp.lt.s32.totalorder %s1738_s27, %s1733_s4 }
  0x6b   : > { %p1736_p1 = pnand %p1734_p12, %p2067_p5 }
  0x6c   : > { %p1741_p10 = por %p1740_p9, %p1739_p8 }
  0x6d   : > { %p1737_p7 = pneg %p1736_p1 }
  0x6f   : > { %p1742_p2 = pnand %p1741_p10, %p1737_p7 }
  0x71   : > { %1745 = shalt.err (!%p1742_p2)
}
  0x72   : > { %s1746_s30 = scalar_lea.vmem %s289_s19, 128  ;;  %s1900_s10 = smov [#allocation9]  }
  0x73   : > { %p1747_p0 = scmp.ne.s32.totalorder %s289_s19, %s1746_s30  ;;  %s1751_s26 = sshll.u32 %s1900_s10, 4  ;;  %s1752_s26 = int_to_ptr.vmem [resolvable:$false] %s1751_s26 }
  0x74   : > { %s1753_s29 = scalar_lea.vmem %s1752_s26, 256  ;;  %p1754_p6 = scmp.lt.s32.totalorder %s289_s19, %s1752_s26 }
  0x75   : > { %p1749_p4 = pnand %p1747_p0, %p2067_p5  ;;  %p1755_p13 = scmp.lt.s32.totalorder %s1753_s29, %s1746_s30 }
  0x77   : > { %p1750_p11 = pneg %p1749_p4  ;;  %p1756_p12 = por %p1755_p13, %p1754_p6 }
  0x79   : > { %p1757_p1 = pnand %p1756_p12, %p1750_p11 }
  0x7b   : > { %1760 = shalt.err (!%p1757_p1)
}
  0x7c   : > { %1553 = dma.hbm_to_vmem [thread:$0]  (!%p2040_p3), %s286_s12, 128, %s289_s19, %s2061_s20  }
  0x7d   : > { %s2133_s14 = scalar_lea.hbm %s2441_s3, %s2036_s17  ;;  %s299_s4 = scalar_lea.vmem [#allocation10], %s2033_s16 }
  0x7e   : > { %s307_s1 = sshll.u32 %s299_s4, 4  ;;  %s2473_s15 = sand.u32 1, %s1895_s24   ;;  %s308_s1 = int_to_ptr.vmem [resolvable:$true] %s307_s1 }
  0x7f   : > { %s296_s27 = scalar_lea.sflag [#allocation11], %s2473_s15  ;;  %s1761_s28 = scalar_lea.hbm %s2133_s14, 128 }
  0x80   : > { %p1762_p7 = scmp.ne.s32.totalorder %s2133_s14, %s1761_s28  ;;  %s1766_s12 = scalar_lea.hbm %s2441_s3, 256 }
  0x81   : > { %p1767_p10 = scmp.lt.s32.totalorder %s2133_s14, %s2441_s3  ;;  %p1768_p2 = scmp.lt.s32.totalorder %s1766_s12, %s1761_s28 }
  0x82   : > { %p1764_p8 = pnand %p1762_p7, %p2067_p5 }
  0x83   : > { %p1769_p0 = por %p1768_p2, %p1767_p10 }
  0x84   : > { %p1765_p9 = pneg %p1764_p8 }
  0x86   : > { %p1770_p4 = pnand %p1769_p0, %p1765_p9 }
  0x88   : > { %1773 = shalt.err (!%p1770_p4)
}
  0x89   : > { %s1774_s16 = scalar_lea.vmem %s308_s1, 128  ;;  %s1901_s10 = smov [#allocation10]  }
  0x8a   : > { %p1775_p11 = scmp.ne.s32.totalorder %s308_s1, %s1774_s16  ;;  %s1779_s26 = sshll.u32 %s1901_s10, 4  ;;  %s1780_s26 = int_to_ptr.vmem [resolvable:$false] %s1779_s26 }
  0x8b   : > { %s1781_s29 = scalar_lea.vmem %s1780_s26, 256  ;;  %p1782_p12 = scmp.lt.s32.totalorder %s308_s1, %s1780_s26 }
  0x8c   : > { %p1777_p6 = pnand %p1775_p11, %p2067_p5  ;;  %p1783_p1 = scmp.lt.s32.totalorder %s1781_s29, %s1774_s16 }
  0x8e   : > { %p1778_p13 = pneg %p1777_p6  ;;  %p1784_p7 = por %p1783_p1, %p1782_p12 }
  0x90   : > { %p1785_p8 = pnand %p1784_p7, %p1778_p13 }
  0x92   : > { %1788 = shalt.err (!%p1785_p8)
}
  0x93   : > { %1556 = dma.hbm_to_vmem [thread:$0]  (!%p2040_p3), %s2133_s14, 128, %s308_s1, %s296_s27  }
  0x94   : > { %p2474_p9 = scmp.ne.s32.totalorder %s2464_s11, 0 }
  0x95   : > { %s2157_s13 = sand.u32 (!%p2474_p9), 1, %s1887_s22   ;;  %p2475_p5 = scmp.ne.s32.totalorder (!%p2474_p9), %s2460_s8, 0 }
  0x96   : > { %316 = sbr.rel (%p2474_p9) target bundleno = 736 (0x2e0), region = 40  ;;  %s2160_s0 = sshll.u32 (!%p2474_p9), %s2157_s13, 3 }
  0x97   : > { %s319_s7 = scalar_lea.sflag (!%p2474_p9), [#allocation5], %s2157_s13  ;;  %s322_s4 = scalar_lea.vmem (!%p2474_p9), [#allocation4], %s2160_s0 }
  0x9b   : > { %1858 = dma.done.wait (%p2475_p5), %s319_s7, 128  }
  0x9c   : > { %1860 = vsyncadd (%p2475_p5), %s319_s7, 4294967168  ;;  %s327_s11 = sand.u32 1, %s1977_s25   ;;  %s331_s14 = scalar_lea.vmem [#allocation7], %s2160_s0 }
  0x9d   : > { %s328_s18 = scalar_lea.sflag [#allocation8], %s327_s11 }
  0x9e   : > { %1862 = dma.done.wait (%p2475_p5), %s328_s18, 256  }
  0x9f   : > { %1864 = vsyncadd (%p2475_p5), %s328_s18, 4294967040  ;;  %s340_s1 = scalar_lea.vmem [#allocation9], %s2160_s0  ;;  %s346_s15 = scalar_lea.sflag [#allocation11], %s327_s11 }
  0xa0   : > { %s349_s27 = scalar_lea.vmem [#allocation10], %s2160_s0 }
  0xa1   : > { %1866 = dma.done.wait (%p2475_p5), %s346_s15, 128  }
  0xa2   : > { %1868 = vsyncadd (%p2475_p5), %s346_s15, 4294967168  ;;  %p2476_p3 = scmp.eq.s32.totalorder %s1977_s25, 0 }
  0xa4   : > { %1870 = dma.done.wait (%p2476_p3), [#allocation11], 128   ;;  %p2477_p10 = pmov %p2476_p3 }
  0xa5   : > { %v475_v0 = vlaneseq  ;;  %v1902_v1 = vmov 0.0   ;;  %vm405_vm0 = vcmask 277504   ;;  %v447_v4 = vld [vmem:[%s331_s14] sm:$0xff]  ;;  %v429_v5 = vld [vmem:[%s340_s1] sm:$0xff]  ;;  %s1903_s8 = smov 17   ;;  %s1904_s28 = smov 32  }
  0xa6   : > { %1872 = vsyncadd (%p2477_p10), [#allocation11], 4294967168  ;;  %403 = vst [vmem:[#allocation2] sm:$0xff] %v1902_v1  ;;  %v430_v6 = vld [vmem:[%s349_s27] sm:$0xff]  ;;  %450 = vrot.lane.b32.xlu0 %v447_v4, %s1903_s8  ;;  %v410_v8 = vld [vmem:[%s322_s4] sm:$0xff]  ;;  %v449_v10 = vcombine.high %v447_v4, %v447_v4  ;;  %s1905_s30 = smov 18  }
  0xa7   : > { %404 = vst [vmem:[#allocation2 + $0x8] sm:$0xff] %v1902_v1  ;;  %407 = vst [vmem:[#allocation2 + $0x18] sm:$0xff] %v1902_v1  ;;  %v476_v2 = vand.u32 127, %v475_v0  ;;  %v431_v7 = vmul.f32 %v430_v6, %v429_v5  ;;  %v412_v9 = vmul.f32 %v447_v4, %v410_v8  ;;  %v463_v15 = vcombine.low %v430_v6, %v430_v6  ;;  %s1906_s20 = smov 16   ;;  %s1907_s12 = smov 2  }
  0xa8   : > { %408 = vst [vmem:[#allocation2 + $0x20] sm:$0xff] %v1902_v1  ;;  %406 = vst.msk [vmem:[#allocation2 + $0x10] sm:$0xff] %vm405_vm0, %v1902_v1  ;;  %s1908_s19 = smov 34   ;;  %vm424_vm5 = vcmask 1043592   ;;  %vm445_vm6 = vcmask 138244   ;;  %vm419_vm7 = vcmask 138240  }
  0xa9   : > { %409 = vst.msk [vmem:[#allocation2 + $0x28] sm:$0xff] %vm405_vm0, %v1902_v1  ;;  %v477_v3 = vadd.s32 128, %v476_v2  ;;  %436 = vrot.lane.b32.xlu1 %v431_v7, %s1903_s8  ;;  %v482_v11 = vand.u32 15, %v476_v2  ;;  %v414_v13 = vcombine.high %v412_v9, %v412_v9  ;;  %v433_v14 = vcombine.low %v431_v7, %v431_v7  ;;  %s1909_s17 = smov 95   ;;  %s1910_s16 = smov 111  }
  0xaa   : > { %415 = vrot.lane.b32.xlu0 %v412_v9, %s1903_s8  ;;  %vm427_vm8 = vcmask 134144   ;;  %vm442_vm9 = vcmask 1047692   ;;  %vm811_vm10 = vcmask 261120   ;;  %vm753_vm11 = vcmask 146432   ;;  %s1911_s10 = smov 96   ;;  %s1912_s26 = smov 110  }
  0xab   : > { %v489_v12 = vand.u32 15, %v477_v3  ;;  %vm502_vm1 = vcmp.ne.s32.totalorder %v482_v11, 0  ;;  %vm508_vm3 = vcmp.ne.s32.totalorder %v482_v11, 15  ;;  %vm652_vm12 = vcmask 130048   ;;  %s1913_s29 = smov 112   ;;  %s1914_s7 = smov 126  }
  0xac   : > { %v2189_v16 = vsel %vm502_vm1, 1.0, %v1902_v1  ;;  %v1417_v18 = vsel %vm508_vm3, 1.0, %v1902_v1  ;;  %vm592_vm13 = vcmask 15360   ;;  %s1915_s4 = smov 127   ;;  %s1916_s11 = smov 94   ;;  %vm570_vm14 = vcmask 1043456  }
  0xad   : > { %452 = vrot.lane.b32.xlu1 %v449_v10, %s1903_s8  ;;  %vm503_vm2 = vcmp.ne.s32.totalorder %v489_v12, 0  ;;  %vm509_vm4 = vcmp.ne.s32.totalorder %v489_v12, 15  ;;  %vm894_vm15 = vcmask 777216   ;;  %vm793_vm1 = vcmask 900096   ;;  %s1520_s18 = sshll.u32 %s1977_s25, 7  ;;  %s401_s14 = scalar_lea.vmem [#allocation14], %s2160_s0 }
  0xae   : > { %417 = vrot.lane.b32.xlu0 %v414_v13, %s1903_s8  ;;  %v2191_v17 = vsel %vm503_vm2, 1.0, %v1902_v1  ;;  %v1418_v19 = vsel %vm509_vm4, 1.0, %v1902_v1  ;;  %vm735_vm2 = vcmask 908288   ;;  %vm692_vm3 = vcmask 916480   ;;  %s1214_s1 = sshll.u32 %s401_s14, 4  ;;  %p2478_p0 = scmp.ne.s32.totalorder %s2461_s9, 0  ;;  %s1215_s1 = int_to_ptr.vmem [resolvable:$true] %s1214_s1 }
  0xaf   : > { %v1618_v20 = vpack.i.bf16 %v2191_v17, %v2189_v16  ;;  %v1623_v21 = vpack.i.bf16 %v1418_v19, %v1417_v18  ;;  %vm632_vm4 = vcmask 1031168  }
  0xb1   : > { %434 = vrot.lane.b32.xlu1 %v433_v14, %s1903_s8 }
  0xb2   : > { %464 = vrot.lane.b32.xlu0 %v463_v15, %s1903_s8 }
  0xb5   : > { %466 = vrot.lane.b32.xlu1 %v430_v6, %s1903_s8  ;;  %s1212_s8 = scalar_lea.hbm %s2444_s6, %s1520_s18 }
  0xb6   : > { %1619 = vrot.lane.b32.xlu0 %v1618_v20, %s1904_s28  ;;  %s1186_s28 = scalar_lea.sflag [#allocation15], %s2157_s13 }
  0xb9   : > { %1624 = vrot.lane.b32.xlu1 %v1623_v21, %s1905_s30  ;;  %s1789_s30 = scalar_lea.vmem %s1215_s1, 128 }
  0xba   : > { %1629 = vrot.lane.b32.xlu0 %v1618_v20, %s1906_s20  ;;  %p1790_p2 = scmp.ne.s32.totalorder %s1215_s1, %s1789_s30  ;;  %s1918_s20 = smov [#allocation14]  }
  0xbc   : > { %p1791_p4 = pnand %p1790_p2, %p2478_p0 }
  0xbd   : > { %1634 = vrot.lane.b32.xlu1 %v1623_v21, %s1907_s12  ;;  %s1793_s12 = sshll.u32 %s1918_s20, 4  ;;  %s1794_s12 = int_to_ptr.vmem [resolvable:$false] %s1793_s12 }
  0xbe   : > { %1639 = vrot.lane.b32.xlu0 %v1623_v21, %s1908_s19  ;;  %p1792_p11 = pneg %p1791_p4  ;;  %s1795_s19 = scalar_lea.vmem %s1794_s12, 256 }
  0xbf   : > { %p1796_p6 = scmp.lt.s32.totalorder %s1215_s1, %s1794_s12  ;;  %p1797_p13 = scmp.lt.s32.totalorder %s1795_s19, %s1789_s30 }
  0xc1   : > { %p1798_p12 = por %p1797_p13, %p1796_p6 }
  0xc3   : > { %p1799_p1 = pnand %p1798_p12, %p1792_p11 }
 0x118   : > { %v451_v22 = vpop.permute.xlu0 %450 }
 0x119   : > { %458 = vst.msk [vmem:[#allocation2 + $0x18] sm:$0xf] %vm424_vm5, %v451_v22 }
 0x11b   : > { %v437_v23 = vpop.permute.xlu1 %436 }
 0x11c   : > { %446 = vst.msk [vmem:[#allocation2 + $0x10] sm:$0xf0] %vm445_vm6, %v437_v23  ;;  %v416_v24 = vpop.permute.xlu0 %415 }
 0x11d   : > { %425 = vst.msk [vmem:[#allocation2] sm:$0xf] %vm424_vm5, %v416_v24  ;;  %vm572_vm5 = vcmask 1039360  }
 0x11f   : > { %v453_v25 = vpop.permute.xlu1 %452 }
 0x120   : > { %v454_v26 = vsel %vm419_vm7, %v451_v22, %v453_v25  ;;  %460 = vst.msk [vmem:[#allocation2 + $0x28] sm:$0xf] %vm427_vm8, %v453_v25  ;;  %v418_v27 = vpop.permute.xlu0 %417 }
 0x121   : > { %459 = vst [vmem:[#allocation2 + $0x20] sm:$0xf] %v454_v26  ;;  %v420_v28 = vsel %vm419_vm7, %v416_v24, %v418_v27  ;;  %428 = vst.msk [vmem:[#allocation2 + $0x10] sm:$0xf] %vm427_vm8, %v418_v27 }
 0x122   : > { %426 = vst [vmem:[#allocation2 + $0x8] sm:$0xf] %v420_v28 }
 0x123   : > { %v435_v29 = vpop.permute.xlu1 %434 }
 0x124   : > { %v438_v30 = vsel %vm419_vm7, %v435_v29, %v437_v23  ;;  %443 = vst.msk [vmem:[#allocation2] sm:$0xf0] %vm442_vm9, %v435_v29  ;;  %v465_v31 = vpop.permute.xlu0 %464 }
 0x125   : > { %444 = vst [vmem:[#allocation2 + $0x8] sm:$0xf0] %v438_v30  ;;  %472 = vst.msk [vmem:[#allocation2 + $0x18] sm:$0xf0] %vm442_vm9, %v465_v31 }
 0x127   : > { %v467_v32 = vpop.permute.xlu1 %466 }
 0x128   : > { %v468_v33 = vsel %vm419_vm7, %v465_v31, %v467_v32  ;;  %474 = vst.msk [vmem:[#allocation2 + $0x28] sm:$0xf0] %vm445_vm6, %v467_v32  ;;  %v1620_v38 = vpop.permute.xlu0 %1619  ;;  %v2221_v42 = vld [vmem:[#allocation2 + $0x10] sm:$0xff]  ;;  %vm951_vm6 = vcmask 769024  }
 0x129   : > { %473 = vst [vmem:[#allocation2 + $0x20] sm:$0xf0] %v468_v33  ;;  %v2217_v40 = vunpack.i.h.bf16 %v1620_v38  ;;  %v2219_v41 = vunpack.i.l.bf16 %v1620_v38  ;;  %v2233_v46 = vpack.c.bf16 %v2221_v42, %v2221_v42 }
 0x12b   : > { %v1625_v43 = vpop.permute.xlu1 %1624  ;;  %v2225_v44 = vld [vmem:[#allocation2] sm:$0xff]  ;;  %v812_v47 = vsel %vm811_vm10, %v2219_v41, %v2217_v40  ;;  %v818_v22 = vmul.f32 %v2217_v40, %v2221_v42 }
 0x12c   : > { %v2207_v36 = vld [vmem:[#allocation2 + $0x18] sm:$0xff]  ;;  %v2227_v45 = vld [vmem:[#allocation2 + $0x8] sm:$0xff]  ;;  %v1627_v48 = vunpack.i.h.bf16 %v1625_v43  ;;  %v1626_v49 = vunpack.i.l.bf16 %v1625_v43  ;;  %v1630_v53 = vpop.permute.xlu0 %1629  ;;  %v2261_v1 = vmul.f32 %v2189_v16, %v2225_v44  ;;  %v816_v24 = vmul.f32 %v2219_v41, %v2225_v44 }
 0x12d   : > { %v2241_v51 = vpack.c.bf16 %v2227_v45, %v2225_v44  ;;  %v819_v54 = vmul.f32 %v2219_v41, %v2207_v36  ;;  %v2252_v60 = vmul.f32 %v2191_v17, %v2227_v45  ;;  %v1632_v62 = vunpack.i.h.bf16 %v1630_v53 }
 0x12e   : > { %v754_v55 = vsel %vm753_vm11, %v1626_v49, %v1627_v48  ;;  %v1631_v63 = vunpack.i.l.bf16 %v1630_v53  ;;  %v2265_v2 = vmul.f32 %v2189_v16, %v2207_v36  ;;  %v761_v4 = vmul.f32 %v1626_v49, %v2207_v36 }
 0x12f   : > { %v2201_v34 = vld [vmem:[#allocation2 + $0x28] sm:$0xff]  ;;  %v1635_v3 = vpop.permute.xlu1 %1634  ;;  %v817_v25 = vmul.f32 %v2227_v45, %v812_v47  ;;  %v1509_v26 = vpack.c.bf16 %v818_v22, %v818_v22  ;;  %v760_v27 = vmul.f32 %v1627_v48, %v2221_v42  ;;  %v758_v29 = vmul.f32 %v1626_v49, %v2225_v44 }
 0x130   : > { %v2205_v35 = vpack.c.bf16 %v2201_v34, %v2201_v34  ;;  %v2209_v37 = vld [vmem:[#allocation2 + $0x20] sm:$0xff]  ;;  %v821_v50 = vmul.f32 %v2217_v40, %v2201_v34  ;;  %v763_v57 = vmul.f32 %v1627_v48, %v2201_v34  ;;  %v1522_v7 = vpack.c.bf16 %v2265_v2, %v2261_v1 }
 0x131   : > { %v2213_v39 = vpack.c.bf16 %v2209_v37, %v2207_v36  ;;  %v820_v52 = vmul.f32 %v2209_v37, %v812_v47  ;;  %v762_v59 = vmul.f32 %v2209_v37, %v754_v55  ;;  %v2256_v61 = vmul.f32 %v2191_v17, %v2209_v37  ;;  %v1640_v47 = vpop.permute.xlu0 %1639 }
 0x132   : > { %887 = vrot.lane.b32.xlu0 %v2205_v35, %s1909_s17  ;;  %v1511_v56 = vpack.c.bf16 %v821_v50, %v821_v50  ;;  %v1507_v6 = vpack.c.bf16 %v763_v57, %v763_v57  ;;  %v653_v9 = vsel %vm652_vm12, %v1631_v63, %v1632_v62  ;;  %v1637_v10 = vunpack.i.h.bf16 %v1635_v3 }
 0x133   : > { %885 = vrot.lane.b32.xlu1 %v2213_v39, %s1909_s17  ;;  %v1510_v58 = vpack.c.bf16 %v820_v52, %v819_v54  ;;  %v1523_v5 = vpack.c.bf16 %v2256_v61, %v2252_v60  ;;  %v1506_v8 = vpack.c.bf16 %v762_v59, %v761_v4  ;;  %v1636_v11 = vunpack.i.l.bf16 %v1635_v3  ;;  %v2323_v4 = vld [vmem:[#allocation12] sm:$0x77] }
 0x134   : > { %v662_v12 = vmul.f32 %v1632_v62, %v2201_v34  ;;  %v660_v13 = vmul.f32 %v1631_v63, %v2207_v36  ;;  %v661_v14 = vmul.f32 %v2209_v37, %v653_v9  ;;  %v602_v17 = vmul.f32 %v1637_v10, %v2201_v34 }
 0x135   : > { %v593_v15 = vsel %vm592_vm13, %v1636_v11, %v1637_v10  ;;  %v600_v19 = vmul.f32 %v1636_v11, %v2207_v36  ;;  %v1508_v28 = vpack.c.bf16 %v817_v25, %v816_v24  ;;  %v759_v30 = vmul.f32 %v2227_v45, %v754_v55 }
 0x136   : > { %728 = vrot.lane.b32.xlu0 %v2205_v35, %s1910_s16  ;;  %v1499_v16 = vpack.c.bf16 %v662_v12, %v662_v12  ;;  %v1498_v18 = vpack.c.bf16 %v661_v14, %v660_v13  ;;  %v601_v20 = vmul.f32 %v2209_v37, %v593_v15  ;;  %v1495_v21 = vpack.c.bf16 %v602_v17, %v602_v17 }
 0x137   : > { %726 = vrot.lane.b32.xlu1 %v2213_v39, %s1910_s16  ;;  %v1505_v31 = vpack.c.bf16 %v760_v27, %v760_v27  ;;  %v659_v32 = vmul.f32 %v1632_v62, %v2221_v42  ;;  %v1504_v33 = vpack.c.bf16 %v759_v30, %v758_v29  ;;  %v599_v40 = vmul.f32 %v1637_v10, %v2221_v42 }
 0x138   : > { %v1494_v23 = vpack.c.bf16 %v601_v20, %v600_v19  ;;  %v657_v41 = vmul.f32 %v1631_v63, %v2225_v44  ;;  %v658_v43 = vmul.f32 %v2227_v45, %v653_v9  ;;  %v597_v50 = vmul.f32 %v1636_v11, %v2225_v44 }
 0x139   : > { %v1497_v38 = vpack.c.bf16 %v659_v32, %v659_v32  ;;  %v1493_v48 = vpack.c.bf16 %v599_v40, %v599_v40  ;;  %v598_v52 = vmul.f32 %v2227_v45, %v593_v15  ;;  %v1642_v53 = vunpack.i.h.bf16 %v1640_v47 }
 0x13a   : > { %883 = vrot.lane.b32.xlu0 %v2233_v46, %s1909_s17  ;;  %v1496_v49 = vpack.c.bf16 %v658_v43, %v657_v41  ;;  %v1641_v54 = vunpack.i.l.bf16 %v1640_v47  ;;  %v1131_v60 = vshrl.u32 %v475_v0, 7  ;;  %v1917_v1 = vmov 1.0  }
 0x13b   : > { %881 = vrot.lane.b32.xlu1 %v2241_v51, %s1909_s17  ;;  %v1492_v55 = vpack.c.bf16 %v598_v52, %v597_v50  ;;  %v921_v62 = vmul.f32 %v1642_v53, %v2201_v34 }
 0x13c   : > { %v916_v57 = vmul.f32 %v1641_v54, %v2225_v44  ;;  %v919_v3 = vmul.f32 %v1641_v54, %v2207_v36 }
 0x13d   : > { %v1519_v44 = vpack.c.bf16 %v921_v62, %v921_v62 }
 0x13e   : > { %844 = vrot.lane.b32.xlu0 %v1511_v56, %s1911_s10  ;;  %v912_v56 = vsel %vm405_vm0, %v1641_v54, %v1642_v53  ;;  %vm851_vm0 = vcmask 785408  }
 0x13f   : > { %842 = vrot.lane.b32.xlu1 %v1510_v58, %s1911_s10  ;;  %v917_v58 = vmul.f32 %v912_v56, %v2227_v45 }
 0x141   : > { %v1516_v63 = vpack.c.bf16 %v917_v58, %v916_v57 }
 0x142   : > { %786 = vrot.lane.b32.xlu0 %v1507_v6, %s1912_s26 }
 0x143   : > { %784 = vrot.lane.b32.xlu1 %v1506_v8, %s1912_s26 }
 0x146   : > { %724 = vrot.lane.b32.xlu0 %v2233_v46, %s1910_s16 }
 0x147   : > { %722 = vrot.lane.b32.xlu1 %v2241_v51, %s1910_s16 }
 0x14a   : > { %685 = vrot.lane.b32.xlu0 %v1499_v16, %s1913_s29 }
 0x14b   : > { %683 = vrot.lane.b32.xlu1 %v1498_v18, %s1913_s29 }
 0x14e   : > { %625 = vrot.lane.b32.xlu0 %v1495_v21, %s1914_s7 }
 0x14f   : > { %623 = vrot.lane.b32.xlu1 %v1494_v23, %s1914_s7 }
 0x152   : > { %840 = vrot.lane.b32.xlu0 %v1509_v26, %s1911_s10 }
 0x153   : > { %838 = vrot.lane.b32.xlu1 %v1508_v28, %s1911_s10 }
 0x156   : > { %782 = vrot.lane.b32.xlu0 %v1505_v31, %s1912_s26 }
 0x157   : > { %780 = vrot.lane.b32.xlu1 %v1504_v33, %s1912_s26 }
 0x15a   : > { %681 = vrot.lane.b32.xlu0 %v1497_v38, %s1913_s29 }
 0x15b   : > { %558 = vrot.lane.b32.xlu1 %v2241_v51, %s1915_s4  ;;  %v918_v51 = vmul.f32 %v1642_v53, %v2221_v42  ;;  %v1454_v42 = vcombine.high %v2323_v4, %v2323_v4 }
 0x15d   : > { %v1517_v59 = vpack.c.bf16 %v918_v51, %v918_v51  ;;  %1473 = vmatprep.mubr.msk.bf16.mxu0 %vm652_vm12, %v1454_v42 }
 0x15e   : > { %621 = vrot.lane.b32.xlu0 %v1493_v48, %s1914_s7 }
 0x15f   : > { %679 = vrot.lane.b32.xlu1 %v1496_v49, %s1913_s29 }
 0x162   : > { %560 = vrot.lane.b32.xlu0 %v2233_v46, %s1915_s4  ;;  %v920_v46 = vmul.f32 %v912_v56, %v2209_v37 }
 0x163   : > { %619 = vrot.lane.b32.xlu1 %v1492_v55, %s1914_s7 }
 0x166   : > { %564 = vrot.lane.b32.xlu0 %v2205_v35, %s1915_s4  ;;  %v1518_v35 = vpack.c.bf16 %v920_v46, %v919_v3 }
 0x167   : > { %562 = vrot.lane.b32.xlu1 %v2213_v39, %s1915_s4 }
 0x16a   : > { %940 = vrot.lane.b32.xlu0 %v1517_v59, %s1916_s11 }
 0x16b   : > { %938 = vrot.lane.b32.xlu1 %v1516_v63, %s1916_s11 }
 0x16e   : > { %944 = vrot.lane.b32.xlu0 %v1519_v44, %s1916_s11 }
 0x16f   : > { %942 = vrot.lane.b32.xlu1 %v1518_v35, %s1916_s11 }
 0x1a4   : > { %v888_v34 = vpop.permute.xlu0 %887 }
 0x1a5   : > { %v886_v39 = vpop.permute.xlu1 %885  ;;  %v892_v37 = vrot.slane %v888_v34, 4 }
 0x1a6   : > { %v891_v6 = vrot.slane %v886_v39, 4 }
 0x1a8   : > { %v729_v45 = vpop.permute.xlu0 %728  ;;  %v896_v12 = vsel %vm570_vm14, %v891_v6, %v892_v37 }
 0x1a9   : > { %v2328_v36 = vpop.permute.xlu1 %726  ;;  %v897_v17 = vsel %vm894_vm15, %v886_v39, %v896_v12  ;;  %v733_v48 = vrot.slane %v729_v45, 4 }
 0x1aa   : > { %v732_v49 = vrot.slane %v2328_v36, 4 }
 0x1ac   : > { %v884_v8 = vpop.permute.xlu0 %883  ;;  %v737_v63 = vsel %vm570_vm14, %v732_v49, %v733_v48 }
 0x1ad   : > { %v890_v9 = vrot.slane %v884_v8, 4  ;;  %v882_v10 = vpop.permute.xlu1 %881  ;;  %v738_v8 = vsel %vm735_vm2, %v2328_v36, %v737_v63 }
 0x1ae   : > { %v889_v11 = vrot.slane %v882_v10, 4 }
 0x1b0   : > { %v845_v13 = vpop.permute.xlu0 %844  ;;  %v893_v14 = vsel %vm570_vm14, %v889_v11, %v890_v9 }
 0x1b1   : > { %v843_v15 = vpop.permute.xlu1 %842  ;;  %v895_v16 = vsel %vm894_vm15, %v882_v10, %v893_v14  ;;  %v849_v28 = vrot.slane %v845_v13, 4 }
 0x1b2   : > { %v1470_v18 = vcombine.high %v895_v16, %v897_v17  ;;  %v1469_v19 = vcombine.low %v895_v16, %v897_v17  ;;  %v848_v29 = vrot.slane %v843_v15, 4 }
 0x1b4   : > { %v787_v20 = vpop.permute.xlu0 %786  ;;  %1077 = vmatprep.subr.bf16.mxu0 %v1470_v18  ;;  %v853_v40 = vsel %vm570_vm14, %v848_v29, %v849_v28 }
 0x1b5   : > { %1078 = vmatpush1.bf16.msra.mxu0 %v1469_v19  ;;  %v785_v21 = vpop.permute.xlu1 %784  ;;  %v791_v31 = vrot.slane %v787_v20, 4  ;;  %v854_v53 = vsel %vm851_vm0, %v843_v15, %v853_v40 }
 0x1b6   : > { %v790_v32 = vrot.slane %v785_v21, 4 }
 0x1b8   : > { %v725_v22 = vpop.permute.xlu0 %724  ;;  %v795_v54 = vsel %vm570_vm14, %v790_v32, %v791_v31 }
 0x1b9   : > { %v723_v23 = vpop.permute.xlu1 %722  ;;  %v731_v41 = vrot.slane %v725_v22, 4  ;;  %v796_v42 = vsel %vm793_vm1, %v785_v21, %v795_v54 }
 0x1ba   : > { %v730_v43 = vrot.slane %v723_v23, 4 }
 0x1bc   : > { %v686_v24 = vpop.permute.xlu0 %685  ;;  %v734_v57 = vsel %vm570_vm14, %v730_v43, %v731_v41 }
 0x1bd   : > { %v684_v25 = vpop.permute.xlu1 %683  ;;  %v736_v44 = vsel %vm735_vm2, %v723_v23, %v734_v57  ;;  %v690_v39 = vrot.slane %v686_v24, 4 }
 0x1be   : > { %v689_v45 = vrot.slane %v684_v25, 4  ;;  %v1464_v9 = vcombine.high %v736_v44, %v738_v8  ;;  %v1463_v17 = vcombine.low %v736_v44, %v738_v8 }
 0x1c0   : > { %v626_v26 = vpop.permute.xlu0 %625  ;;  %v694_v14 = vsel %vm570_vm14, %v689_v45, %v690_v39 }
 0x1c1   : > { %v2332_v27 = vpop.permute.xlu1 %623  ;;  %v630_v11 = vrot.slane %v626_v26, 4  ;;  %v695_v36 = vsel %vm692_vm3, %v684_v25, %v694_v14 }
 0x1c2   : > { %v629_v12 = vrot.slane %v2332_v27, 4 }
 0x1c4   : > { %v841_v30 = vpop.permute.xlu0 %840  ;;  %v634_v20 = vsel %vm570_vm14, %v629_v12, %v630_v11 }
 0x1c5   : > { %v847_v33 = vrot.slane %v841_v30, 4  ;;  %v839_v38 = vpop.permute.xlu1 %838 }
 0x1c6   : > { %v846_v47 = vrot.slane %v839_v38, 4 }
 0x1c8   : > { %v850_v50 = vsel %vm570_vm14, %v846_v47, %v847_v33  ;;  %v783_v52 = vpop.permute.xlu0 %782  ;;  %v635_v33 = vsel %vm632_vm4, %v2332_v27, %v634_v20 }
 0x1c9   : > { %v852_v55 = vsel %vm851_vm0, %v839_v38, %v850_v50  ;;  %v789_v56 = vrot.slane %v783_v52, 4  ;;  %v781_v51 = vpop.permute.xlu1 %780 }
 0x1ca   : > { %v1467_v58 = vcombine.low %v852_v55, %v854_v53  ;;  %v1468_v59 = vcombine.high %v852_v55, %v854_v53  ;;  %v788_v62 = vrot.slane %v781_v51, 4 }
 0x1cc   : > { %v792_v3 = vsel %vm570_vm14, %v788_v62, %v789_v56  ;;  %v682_v46 = vpop.permute.xlu0 %681  ;;  %1079 = vmatprep.subr.bf16.mxu0 %v1468_v59 }
 0x1cd   : > { %v794_v35 = vsel %vm793_vm1, %v781_v51, %v792_v3  ;;  %1080 = vmatpush1.bf16.msra.mxu0 %v1467_v58  ;;  %v559_v34 = vpop.permute.xlu1 %558  ;;  %v688_v15 = vrot.slane %v682_v46, 4 }
 0x1ce   : > { %v1465_v37 = vcombine.low %v794_v35, %v796_v42  ;;  %v1466_v6 = vcombine.high %v794_v35, %v796_v42  ;;  %v566_v30 = vrot.slane %v559_v34, 4 }
 0x1d0   : > { %v622_v10 = vpop.permute.xlu0 %621  ;;  %1081 = vmatprep.subr.bf16.mxu0 %v1466_v6 }
 0x1d1   : > { %1082 = vmatpush1.bf16.msra.mxu0 %v1465_v37  ;;  %v680_v13 = vpop.permute.xlu1 %679  ;;  %v628_v21 = vrot.slane %v622_v10, 4 }
 0x1d2   : > { %v687_v16 = vrot.slane %v680_v13, 4  ;;  %1083 = vmatprep.subr.bf16.mxu0 %v1464_v9 }
 0x1d4   : > { %v691_v18 = vsel %vm570_vm14, %v687_v16, %v688_v15  ;;  %v561_v19 = vpop.permute.xlu0 %560 }
 0x1d5   : > { %v693_v22 = vsel %vm692_vm3, %v680_v13, %v691_v18  ;;  %1084 = vmatpush1.bf16.msra.mxu0 %v1463_v17  ;;  %v620_v23 = vpop.permute.xlu1 %619  ;;  %v567_v28 = vrot.slane %v561_v19, 4 }
 0x1d6   : > { %v1461_v24 = vcombine.low %v693_v22, %v695_v36  ;;  %v1462_v26 = vcombine.high %v693_v22, %v695_v36  ;;  %v627_v29 = vrot.slane %v620_v23, 4 }
 0x1d7   : > { %v571_v41 = vsel %vm570_vm14, %v566_v30, %v567_v28 }
 0x1d8   : > { %v631_v31 = vsel %vm570_vm14, %v627_v29, %v628_v21  ;;  %v565_v32 = vpop.permute.xlu0 %564  ;;  %1085 = vmatprep.subr.bf16.mxu0 %v1462_v26  ;;  %v573_v52 = vsel %vm572_vm5, %v559_v34, %v571_v41  ;;  %v1453_v34 = vcombine.low %v2323_v4, %v2323_v4 }
 0x1d9   : > { %v633_v25 = vsel %vm632_vm4, %v620_v23, %v631_v31  ;;  %v569_v38 = vrot.slane %v565_v32, 4  ;;  %1086 = vmatpush1.bf16.msra.mxu0 %v1461_v24  ;;  %v563_v40 = vpop.permute.xlu1 %562 }
 0x1da   : > { %v1459_v43 = vcombine.low %v633_v25, %v635_v33  ;;  %v1460_v47 = vcombine.high %v633_v25, %v635_v33  ;;  %v568_v48 = vrot.slane %v563_v40, 4 }
 0x1dc   : > { %v574_v49 = vsel %vm570_vm14, %v568_v48, %v569_v38  ;;  %v941_v50 = vpop.permute.xlu0 %940  ;;  %1087 = vmatprep.subr.bf16.mxu0 %v1460_v47 }
 0x1dd   : > { %v575_v53 = vsel %vm572_vm5, %v563_v40, %v574_v49  ;;  %1088 = vmatpush1.bf16.msra.mxu0 %v1459_v43  ;;  %v939_v54 = vpop.permute.xlu1 %938  ;;  %v947_v56 = vrot.slane %v941_v50, 4 }
 0x1de   : > { %v1457_v27 = vcombine.low %v573_v52, %v575_v53  ;;  %v1458_v55 = vcombine.high %v573_v52, %v575_v53  ;;  %v946_v51 = vrot.slane %v939_v54, 4 }
 0x1e0   : > { %v945_v57 = vpop.permute.xlu0 %944  ;;  %1089 = vmatprep.subr.bf16.mxu0 %v1458_v55  ;;  %v950_v62 = vsel %vm570_vm14, %v946_v51, %v947_v56 }
 0x1e1   : > { %v949_v58 = vrot.slane %v945_v57, 4  ;;  %1090 = vmatpush1.bf16.msra.mxu0 %v1457_v27  ;;  %v943_v59 = vpop.permute.xlu1 %942  ;;  %v952_v46 = vsel %vm951_vm6, %v939_v54, %v950_v62 }
 0x1e2   : > { %v948_v63 = vrot.slane %v943_v59, 4  ;;  %1091 = vmatprep.subr.bf16.mxu0 %v1523_v5  ;;  %v2367_v5 = vsub.s32 4, %v1131_v60 }
 0x1e4   : > { %v953_v3 = vsel %vm570_vm14, %v948_v63, %v949_v58 }
 0x1e5   : > { %v954_v42 = vsel %vm951_vm6, %v943_v59, %v953_v3  ;;  %1092 = vmatpush1.bf16.msra.mxu0 %v1522_v7 }
 0x1e6   : > { %v1471_v44 = vcombine.low %v952_v46, %v954_v42  ;;  %v1472_v35 = vcombine.high %v952_v46, %v954_v42 }
 0x1e8   : > { %1107 = vmatprep.subr.bf16.mxu0 %v1472_v35 }
 0x1e9   : > { %1108 = vmatpush2.bf16.msra.mxu0 %v1471_v44 }
 0x1ec   : > { %1110 = vmatmul.mubr.bf16.vlgmr.msra.gmra.mxu0 %v1453_v34 }
 0x2ac   : > { %v1111_v61 = vpop.f32.mrf.mxu0 }
 0x2ad   : > { %vm1118_vm7 = vcmp.eq.f32.partialorder %v1111_v61, 0.0 }
 0x2ae   : > { %v1120_v39 = vsel %vm1118_vm7, 1.0, %v1111_v61  ;;  %v1165_v2 = vsel %vm1118_vm7, 0.0, %v1917_v1  ;;  %v1113_v7 = vpop.f32.mrf.mxu0 }
 0x2af   : > { %1647 = vrcp.f32 %v1120_v39  ;;  %vm1119_vm8 = vcmp.eq.f32.partialorder %v1113_v7, 0.0  ;;  %v1170_v37 = vrot.slane %v1165_v2, %v2367_v5 }
 0x2b0   : > { %v1121_v4 = vsel %vm1119_vm8, 1.0, %v1113_v7  ;;  %v1166_v45 = vsel %vm1119_vm8, 0.0, %v1917_v1  ;;  %v1115_v0 = vpop.f32.mrf.mxu0 }
 0x2b1   : > { %1649 = vrcp.f32 %v1121_v4  ;;  %v1174_v6 = vrot.slane %v1166_v45, %v2367_v5 }
 0x2b2   : > { %v1116_v8 = vpop.f32.mrf.mxu0 }
 0x2b3   : > { %v1177_v9 = vcombine.low %v1170_v37, %v1174_v6 }
 0x2b5   : > { %1179 = vst [vmem:[%s401_s14] sm:$0xff] %v1177_v9 }
 0x2b6   : > { %1802 = shalt.err (!%p1799_p1)
}
 0x2b7   : > { %s1803_s17 = scalar_lea.hbm %s1212_s8, 128  ;;  %s1807_s26 = scalar_lea.hbm %s2444_s6, 256 }
 0x2b8   : > { %p1804_p7 = scmp.ne.s32.totalorder %s1212_s8, %s1803_s17  ;;  %p1808_p5 = scmp.lt.s32.totalorder %s1212_s8, %s2444_s6 }
 0x2b9   : > { %p1809_p3 = scmp.lt.s32.totalorder %s1807_s26, %s1803_s17 }
 0x2ba   : > { %p1805_p8 = pnand %p1804_p7, %p2478_p0 }
 0x2bb   : > { %p1810_p10 = por %p1809_p3, %p1808_p5 }
 0x2bc   : > { %p1806_p9 = pneg %p1805_p8 }
 0x2be   : > { %p1811_p2 = pnand %p1810_p10, %p1806_p9 }
 0x2c0   : > { %1814 = shalt.err (!%p1811_p2)
}
 0x2c1   : > { %1537 = dma.vmem_to_hbm [thread:$0]  (%p2478_p0), %s1215_s1, 128, %s1212_s8, %s1186_s28   ;;  %v1648_v10 = vpop.eup %1647  ;;  %v1919_v14 = vmov 0  }
 0x2c2   : > { %v1124_v11 = vmul.f32 %v1648_v10, %v1120_v39  ;;  %v1650_v12 = vpop.eup %1649  ;;  %v1140_v15 = vsel %vm1118_vm7, 1, %v1919_v14  ;;  %v1141_v19 = vsel %vm1119_vm8, 1, %v1919_v14  ;;  %s394_s4 = scalar_lea.vmem [#allocation13], %s2160_s0  ;;  %s1198_s15 = scalar_lea.hbm %s2443_s5, %s1520_s18 }
 0x2c3   : > { %v1125_v16 = vmul.f32 %v1650_v12, %v1121_v4  ;;  %v1145_v36 = vrot.slane %v1140_v15, %v2367_v5  ;;  %v1149_v22 = vrot.slane %v1141_v19, %v2367_v5  ;;  %s1200_s11 = sshll.u32 %s394_s4, 4  ;;  %s1181_s27 = scalar_lea.sflag [#allocation6], %s2157_s13  ;;  %s1201_s11 = int_to_ptr.vmem [resolvable:$true] %s1200_s11 }
 0x2c4   : > { %v1126_v13 = vsub.f32 2.0, %v1124_v11  ;;  %s1815_s8 = scalar_lea.vmem %s1201_s11, 128  ;;  %s1920_s28 = smov [#allocation13]  }
 0x2c5   : > { %v1127_v18 = vsub.f32 2.0, %v1125_v16  ;;  %vm1150_vm9 = vcmp.eq.s32.totalorder %v1145_v36, 1  ;;  %vm1151_vm10 = vcmp.eq.s32.totalorder %v1149_v22, 1  ;;  %p1816_p4 = scmp.ne.s32.totalorder %s1201_s11, %s1815_s8  ;;  %s1819_s30 = sshll.u32 %s1920_s28, 4  ;;  %s1820_s30 = int_to_ptr.vmem [resolvable:$false] %s1819_s30 }
 0x2c6   : > { %v1128_v17 = vmul.f32 %v1648_v10, %v1126_v13  ;;  %s1821_s0 = scalar_lea.vmem %s1820_s30, 256  ;;  %p1822_p13 = scmp.lt.s32.totalorder %s1201_s11, %s1820_s30 }
 0x2c7   : > { %v1129_v21 = vmul.f32 %v1650_v12, %v1127_v18  ;;  %p1817_p11 = pnand %p1816_p4, %p2478_p0  ;;  %p1823_p12 = scmp.lt.s32.totalorder %s1821_s0, %s1815_s8 }
 0x2c8   : > { %v1133_v20 = vrot.slane %v1128_v17, %v2367_v5 }
 0x2c9   : > { %v1137_v24 = vrot.slane %v1129_v21, %v2367_v5  ;;  %p1818_p6 = pneg %p1817_p11  ;;  %p1824_p1 = por %p1823_p12, %p1822_p13 }
 0x2ca   : > { %v1138_v23 = vmul.f32 %v1133_v20, %v1111_v61 }
 0x2cb   : > { %v1139_v28 = vmul.f32 %v1137_v24, %v1113_v7  ;;  %p1825_p7 = pnand %p1824_p1, %p1818_p6 }
 0x2cc   : > { %v1152_v26 = vsel %vm1150_vm9, 0.0, %v1138_v23 }
 0x2cd   : > { %v1156_v29 = vmul.f32 0.01, %v1152_v26  ;;  %vm1154_vm11 = vcmp.ge.f32.partialorder %v1152_v26, 0.0  ;;  %v1153_v30 = vsel %vm1151_vm10, 0.0, %v1139_v28 }
 0x2ce   : > { %vm1155_vm12 = vcmp.ge.f32.partialorder %v1153_v30, 0.0  ;;  %v1157_v31 = vmul.f32 0.01, %v1153_v30 }
 0x2cf   : > { %v1158_v32 = vsel %vm1154_vm11, %v1152_v26, %v1156_v29 }
 0x2d0   : > { %v1159_v33 = vsel %vm1155_vm12, %v1153_v30, %v1157_v31 }
 0x2d1   : > { %v1162_v25 = vcombine.low %v1158_v32, %v1159_v33 }
 0x2d3   : > { %1164 = vst [vmem:[%s394_s4] sm:$0xff] %v1162_v25 }
 0x2d4   : > { %1828 = shalt.err (!%p1825_p7)
}
 0x2d5   : > { %s1829_s25 = scalar_lea.hbm %s1198_s15, 128  ;;  %s1833_s20 = scalar_lea.hbm %s2443_s5, 256 }
 0x2d6   : > { %p1830_p8 = scmp.ne.s32.totalorder %s1198_s15, %s1829_s25  ;;  %p1834_p3 = scmp.lt.s32.totalorder %s1198_s15, %s2443_s5 }
 0x2d7   : > { %p1835_p10 = scmp.lt.s32.totalorder %s1833_s20, %s1829_s25 }
 0x2d8   : > { %p1831_p9 = pnand %p1830_p8, %p2478_p0 }
 0x2d9   : > { %p1836_p2 = por %p1835_p10, %p1834_p3 }
 0x2da   : > { %p1832_p5 = pneg %p1831_p9 }
 0x2dc   : > { %p1837_p4 = pnand %p1836_p2, %p1832_p5 }
 0x2de   : > { %1840 = shalt.err (!%p1837_p4)
}
 0x2df   : > { %1536 = dma.vmem_to_hbm [thread:$0]  (%p2478_p0), %s1201_s11, 128, %s1198_s15, %s1181_s27  }
 0x2e0 PF: > { %s2479_s17 = sld [smem:[#allocation24_spill]]  ;;  %s1226_s16 = sand.u32 1, %s1883_s21  }
 0x2e1   : > { %p2481_p6 = scmp.ge.s32.totalorder %s1895_s24, 2  ;;  %s1227_s10 = scalar_lea.sflag [#allocation6], %s1226_s16 }
 0x2e6   : > { %p2480_p11 = scmp.ne.s32.totalorder %s2479_s17, 0 }
 0x2e8   : > { %p1558_p13 = pnand %p2481_p6, %p2480_p11 }
 0x2ea   : > { %p1559_p12 = pneg %p1558_p13 }
 0x2ec   : > { %1874 = dma.done.wait (%p1559_p12), %s1227_s10, 128  }
 0x2ed   : > { %1876 = vsyncadd (%p1559_p12), %s1227_s10, 4294967168  ;;  %s1236_s26 = scalar_lea.sflag [#allocation15], %s1226_s16 }
 0x2ee   : > { %1878 = dma.done.wait (%p1559_p12), %s1236_s26, 128  }
 0x2ef   : > { %1880 = vsyncadd (%p1559_p12), %s1236_s26, 4294967168  ;;  %s2482_s24 = sld [smem:[#allocation22_spill]]  ;;  %s2484_s21 = smov %s1887_s22 }
 0x2f0   : > { %s2483_s9 = sld [smem:[#allocation23_spill]]  ;;  %s2485_s22 = smov %s1891_s23 }
 0x2f5   : > { %p29_p0 = scmp.ge.s32.totalorder %s2482_s24, 4  }
 0x2f6   : > { %s2486_s23 = smov %s2483_s9 }
 0x2f7   :  { %31 = sbr.rel (!%p29_p0) target bundleno = 15 (0xf), region = 143 }
 0x2fc   :  { %1241 = vsyncpa [#allocation5], 1 }
 0x2fd   :  { %1243 = vsyncpa [#allocation5 + $0x1], 1 }
 0x2fe   :  { %1244 = vsyncpa [#allocation8], 1 }
 0x2ff   :  { %1246 = vsyncpa [#allocation8 + $0x1], 1 }
 0x300   :  { %1247 = vsyncpa [#allocation11], 1 }
 0x301   :  { %1249 = vsyncpa [#allocation11 + $0x1], 1 }
 0x302   :  { %1250 = vsyncpa [#allocation6], 1 }
 0x303   :  { %1252 = vsyncpa [#allocation6 + $0x1], 1 }
 0x304   :  { %1253 = vsyncpa [#allocation15], 1 }
 0x305   :  { %1255 = vsyncpa [#allocation15 + $0x1], 1 }

</bundles_post_ra>
